<compile_context>
chip_gen: v7x
topology: tpu7x:2x2x1
jax: 0.10.0
libtpu: 0.0.40
codegen_flags: <defaults>
</compile_context>

<pallas_src>
import jax
import jax.numpy as jnp
from jax.experimental import pallas as pl
from jax.experimental.pallas import tpu as pltpu


# ---------------------------------------------------------------------------
# Fused DSC kernel: depthwise 3x3 (stride 1, pad 1) -> pointwise 1x1 (+biases)
# ---------------------------------------------------------------------------
def _dsc_kernel(x_ref, dww_ref, dwb_ref, pww_ref, pwb_ref, o_ref):
    """One batch element per grid step.

    x_ref  : (1, H+2, W+2, Cin) f32   zero-padded NHWC input
    dww_ref: (9, Cin)           f32   depthwise taps, row = ky*3 + kx
    dwb_ref: (1, Cin)           f32   depthwise bias
    pww_ref: (Cin, Cout)        bf16  pointwise weight
    pwb_ref: (1, Cout)          f32   pointwise bias
    o_ref  : (1, H, W, Cout)    f32
    """
    _, H, W, Cout = o_ref.shape
    Cin = x_ref.shape[-1]
    xv = x_ref[...]                       # (1, H+2, W+2, Cin)
    wv = dww_ref[...]                     # (9, Cin)

    # Depthwise 3x3 (VPU): accumulator starts as bias + first tap product
    # (saves a zero-fill pass and a separate bias-add epilogue).
    acc = (dwb_ref[...].reshape(1, 1, 1, Cin)
           + xv[:, 0:H, 0:W, :] * wv[0].reshape(1, 1, 1, Cin))
    for ky in range(3):
        for kx in range(3):
            if ky == 0 and kx == 0:
                continue
            tap = wv[ky * 3 + kx].reshape(1, 1, 1, Cin)
            acc = acc + xv[:, ky:ky + H, kx:kx + W, :] * tap

    # Pointwise 1x1 (MXU): lane-dense (H*W, Cin) @ (Cin, Cout), bf16 operands,
    # f32 accumulate.  The depthwise intermediate never leaves the chip.
    lhs = acc.reshape(H * W, Cin).astype(jnp.bfloat16)
    out = jnp.dot(lhs, pww_ref[...], preferred_element_type=jnp.float32)
    out = out + pwb_ref[...]
    o_ref[...] = out.reshape(1, H, W, Cout)


# ---------------------------------------------------------------------------
# Wrapper: NCHW -> NHWC, pad once, single fused pallas_call, NHWC -> NCHW
# ---------------------------------------------------------------------------
@jax.jit
def dsc_forward(x_nchw, dw_w, dw_b, pw_w, pw_b):
    x = jnp.transpose(x_nchw, (0, 2, 3, 1)).astype(jnp.float32)   # NCHW->NHWC
    N, H, W, Cin = x.shape
    Cout = pw_w.shape[1]

    xp = jnp.pad(x, ((0, 0), (1, 1), (1, 1), (0, 0)))
    pw_w_bf = pw_w.astype(jnp.bfloat16)   # bf16-native MXU operand

    cost = pl.CostEstimate(
        flops=2 * N * H * W * Cin * 9 + 2 * N * H * W * Cin * Cout,
        transcendentals=0,
        bytes_accessed=(xp.size * 4 + dw_w.size * 4 + dw_b.size * 4
                        + pw_w_bf.size * 2 + pw_b.size * 4
                        + N * H * W * Cout * 4),
    )

    out_nhwc = pl.pallas_call(
        _dsc_kernel,
        out_shape=jax.ShapeDtypeStruct((N, H, W, Cout), jnp.float32),
        grid_spec=pltpu.PrefetchScalarGridSpec(
            num_scalar_prefetch=0,
            grid=(N,),
            in_specs=[
                pl.BlockSpec((1, H + 2, W + 2, Cin), lambda n: (n, 0, 0, 0)),
                pl.BlockSpec((9, Cin), lambda n: (0, 0)),
                pl.BlockSpec((1, Cin), lambda n: (0, 0)),
                pl.BlockSpec((Cin, Cout), lambda n: (0, 0)),
                pl.BlockSpec((1, Cout), lambda n: (0, 0)),
            ],
            out_specs=pl.BlockSpec((1, H, W, Cout), lambda n: (n, 0, 0, 0)),
        ),
        compiler_params=pltpu.CompilerParams(
            dimension_semantics=("parallel",)),
        cost_estimate=cost,
    )(xp, dw_w, dw_b, pw_w_bf, pw_b)

    return jnp.transpose(out_nhwc, (0, 3, 1, 2))                  # NHWC->NCHW


# ---------------------------------------------------------------------------
# Pure-JAX f32 reference (for a correctness check against the fused kernel)
# ---------------------------------------------------------------------------
def dsc_reference(x_nchw, dw_w, dw_b, pw_w, pw_b):
    x = jnp.transpose(x_nchw, (0, 2, 3, 1)).astype(jnp.float32)
    N, H, W, Cin = x.shape
    xp = jnp.pad(x, ((0, 0), (1, 1), (1, 1), (0, 0)))
    dw = jnp.broadcast_to(dw_b.reshape(1, 1, 1, Cin), (N, H, W, Cin))
    for ky in range(3):
        for kx in range(3):
            dw = dw + xp[:, ky:ky + H, kx:kx + W, :] \
                * dw_w[ky * 3 + kx].reshape(1, 1, 1, Cin)
    out = jnp.einsum('nhwc,cd->nhwd', dw, pw_w) + pw_b.reshape(1, 1, 1, -1)
    return jnp.transpose(out, (0, 3, 1, 2))


if __name__ == "__main__":
    key = jax.random.PRNGKey(0)
    k_x, k_dw, k_db, k_pw, k_pb = jax.random.split(key, 5)

    # Small but lane-dense shapes (channels a multiple of 128 keeps every
    # vector register / store full-width).
    N, Cin, Cout, H, W = 2, 128, 128, 16, 16

    x = jax.random.normal(k_x, (N, Cin, H, W), jnp.float32)         # NCHW
    dw_w = jax.random.normal(k_dw, (9, Cin), jnp.float32) * jnp.sqrt(2.0 / 9.0)
    dw_b = jax.random.normal(k_db, (1, Cin), jnp.float32) * 0.01
    pw_w = jax.random.normal(k_pw, (Cin, Cout), jnp.float32) * jnp.sqrt(2.0 / Cin)
    pw_b = jax.random.normal(k_pb, (1, Cout), jnp.float32) * 0.01

    out = dsc_forward(x, dw_w, dw_b, pw_w, pw_b)
    out = jax.block_until_ready(out)

    assert out.shape == (N, Cout, H, W), out.shape
    assert bool(jnp.all(jnp.isfinite(out)))

    # Correctness vs f32 reference (tolerance covers bf16 MXU operands).
    ref = dsc_reference(x, dw_w, dw_b, pw_w, pw_b)
    err = float(jnp.max(jnp.abs(out - ref)))
    scale = float(jnp.max(jnp.abs(ref)))
    assert err <= 1e-2 * scale + 1e-1, (err, scale)

    print("KERNEL_OK")
</pallas_src>

<mosaic_0001>
module attributes {stable_mosaic.version = 11 : i64} {
  func.func @_dsc_kernel(%arg0: i32, %arg1: memref<1x18x18x128xf32, #tpu.memory_space<vmem>>, %arg2: memref<9x128xf32, #tpu.memory_space<vmem>>, %arg3: memref<1x128xf32, #tpu.memory_space<vmem>>, %arg4: memref<128x128xbf16, #tpu.memory_space<vmem>>, %arg5: memref<1x128xf32, #tpu.memory_space<vmem>>, %arg6: memref<1x16x16x128xf32, #tpu.memory_space<vmem>>) attributes {dimension_semantics = [#tpu.dimension_semantics<parallel>], iteration_bounds = array<i64: 2>, scalar_prefetch = 0 : i64, scratch_operands = 0 : i64, tpu.core_type = #tpu.core_type<tc>, window_params = [{transform_indices = @transform_0, window_bounds = array<i64: 1, 18, 18, 128>}, {pipeline_mode = #tpu.pipeline_mode<synchronous>, transform_indices = @transform_1, window_bounds = array<i64: 9, 128>}, {pipeline_mode = #tpu.pipeline_mode<synchronous>, transform_indices = @transform_2, window_bounds = array<i64: 1, 128>}, {pipeline_mode = #tpu.pipeline_mode<synchronous>, transform_indices = @transform_3, window_bounds = array<i64: 128, 128>}, {pipeline_mode = #tpu.pipeline_mode<synchronous>, transform_indices = @transform_4, window_bounds = array<i64: 1, 128>}, {transform_indices = @transform_5, window_bounds = array<i64: 1, 16, 16, 128>}]} {
    %c0 = arith.constant 0 : index
    %c0_0 = arith.constant 0 : index
    %c0_1 = arith.constant 0 : index
    %c0_2 = arith.constant 0 : index
    %0 = vector.load %arg1[%c0, %c0_0, %c0_1, %c0_2] : memref<1x18x18x128xf32, #tpu.memory_space<vmem>>, vector<1x18x18x128xf32>
    %c0_3 = arith.constant 0 : index
    %c0_4 = arith.constant 0 : index
    %1 = vector.load %arg2[%c0_3, %c0_4] : memref<9x128xf32, #tpu.memory_space<vmem>>, vector<9x128xf32>
    %c0_5 = arith.constant 0 : index
    %c0_6 = arith.constant 0 : index
    %2 = vector.load %arg3[%c0_5, %c0_6] : memref<1x128xf32, #tpu.memory_space<vmem>>, vector<1x128xf32>
    %3 = vector.shape_cast %2 : vector<1x128xf32> to vector<1x1x1x128xf32>
    %4 = vector.extract_strided_slice %0 {offsets = [0, 0, 0, 0], sizes = [1, 16, 16, 128], strides = [1, 1, 1, 1]} : vector<1x18x18x128xf32> to vector<1x16x16x128xf32>
    %5 = vector.extract_strided_slice %1 {offsets = [0, 0], sizes = [1, 128], strides = [1, 1]} : vector<9x128xf32> to vector<1x128xf32>
    %6 = vector.shape_cast %5 : vector<1x128xf32> to vector<128xf32>
    %7 = vector.shape_cast %6 : vector<128xf32> to vector<1x1x1x128xf32>
    %8 = vector.broadcast %7 : vector<1x1x1x128xf32> to vector<1x16x16x128xf32>
    %9 = arith.mulf %4, %8 : vector<1x16x16x128xf32>
    %10 = vector.broadcast %3 : vector<1x1x1x128xf32> to vector<1x16x16x128xf32>
    %11 = arith.addf %10, %9 : vector<1x16x16x128xf32>
    %12 = vector.extract_strided_slice %1 {offsets = [1, 0], sizes = [1, 128], strides = [1, 1]} : vector<9x128xf32> to vector<1x128xf32>
    %13 = vector.shape_cast %12 : vector<1x128xf32> to vector<128xf32>
    %14 = vector.shape_cast %13 : vector<128xf32> to vector<1x1x1x128xf32>
    %15 = vector.extract_strided_slice %0 {offsets = [0, 0, 1, 0], sizes = [1, 16, 16, 128], strides = [1, 1, 1, 1]} : vector<1x18x18x128xf32> to vector<1x16x16x128xf32>
    %16 = vector.broadcast %14 : vector<1x1x1x128xf32> to vector<1x16x16x128xf32>
    %17 = arith.mulf %15, %16 : vector<1x16x16x128xf32>
    %18 = arith.addf %11, %17 : vector<1x16x16x128xf32>
    %19 = vector.extract_strided_slice %1 {offsets = [2, 0], sizes = [1, 128], strides = [1, 1]} : vector<9x128xf32> to vector<1x128xf32>
    %20 = vector.shape_cast %19 : vector<1x128xf32> to vector<128xf32>
    %21 = vector.shape_cast %20 : vector<128xf32> to vector<1x1x1x128xf32>
    %22 = vector.extract_strided_slice %0 {offsets = [0, 0, 2, 0], sizes = [1, 16, 16, 128], strides = [1, 1, 1, 1]} : vector<1x18x18x128xf32> to vector<1x16x16x128xf32>
    %23 = vector.broadcast %21 : vector<1x1x1x128xf32> to vector<1x16x16x128xf32>
    %24 = arith.mulf %22, %23 : vector<1x16x16x128xf32>
    %25 = arith.addf %18, %24 : vector<1x16x16x128xf32>
    %26 = vector.extract_strided_slice %1 {offsets = [3, 0], sizes = [1, 128], strides = [1, 1]} : vector<9x128xf32> to vector<1x128xf32>
    %27 = vector.shape_cast %26 : vector<1x128xf32> to vector<128xf32>
    %28 = vector.shape_cast %27 : vector<128xf32> to vector<1x1x1x128xf32>
    %29 = vector.extract_strided_slice %0 {offsets = [0, 1, 0, 0], sizes = [1, 16, 16, 128], strides = [1, 1, 1, 1]} : vector<1x18x18x128xf32> to vector<1x16x16x128xf32>
    %30 = vector.broadcast %28 : vector<1x1x1x128xf32> to vector<1x16x16x128xf32>
    %31 = arith.mulf %29, %30 : vector<1x16x16x128xf32>
    %32 = arith.addf %25, %31 : vector<1x16x16x128xf32>
    %33 = vector.extract_strided_slice %1 {offsets = [4, 0], sizes = [1, 128], strides = [1, 1]} : vector<9x128xf32> to vector<1x128xf32>
    %34 = vector.shape_cast %33 : vector<1x128xf32> to vector<128xf32>
    %35 = vector.shape_cast %34 : vector<128xf32> to vector<1x1x1x128xf32>
    %36 = vector.extract_strided_slice %0 {offsets = [0, 1, 1, 0], sizes = [1, 16, 16, 128], strides = [1, 1, 1, 1]} : vector<1x18x18x128xf32> to vector<1x16x16x128xf32>
    %37 = vector.broadcast %35 : vector<1x1x1x128xf32> to vector<1x16x16x128xf32>
    %38 = arith.mulf %36, %37 : vector<1x16x16x128xf32>
    %39 = arith.addf %32, %38 : vector<1x16x16x128xf32>
    %40 = vector.extract_strided_slice %1 {offsets = [5, 0], sizes = [1, 128], strides = [1, 1]} : vector<9x128xf32> to vector<1x128xf32>
    %41 = vector.shape_cast %40 : vector<1x128xf32> to vector<128xf32>
    %42 = vector.shape_cast %41 : vector<128xf32> to vector<1x1x1x128xf32>
    %43 = vector.extract_strided_slice %0 {offsets = [0, 1, 2, 0], sizes = [1, 16, 16, 128], strides = [1, 1, 1, 1]} : vector<1x18x18x128xf32> to vector<1x16x16x128xf32>
    %44 = vector.broadcast %42 : vector<1x1x1x128xf32> to vector<1x16x16x128xf32>
    %45 = arith.mulf %43, %44 : vector<1x16x16x128xf32>
    %46 = arith.addf %39, %45 : vector<1x16x16x128xf32>
    %47 = vector.extract_strided_slice %1 {offsets = [6, 0], sizes = [1, 128], strides = [1, 1]} : vector<9x128xf32> to vector<1x128xf32>
    %48 = vector.shape_cast %47 : vector<1x128xf32> to vector<128xf32>
    %49 = vector.shape_cast %48 : vector<128xf32> to vector<1x1x1x128xf32>
    %50 = vector.extract_strided_slice %0 {offsets = [0, 2, 0, 0], sizes = [1, 16, 16, 128], strides = [1, 1, 1, 1]} : vector<1x18x18x128xf32> to vector<1x16x16x128xf32>
    %51 = vector.broadcast %49 : vector<1x1x1x128xf32> to vector<1x16x16x128xf32>
    %52 = arith.mulf %50, %51 : vector<1x16x16x128xf32>
    %53 = arith.addf %46, %52 : vector<1x16x16x128xf32>
    %54 = vector.extract_strided_slice %1 {offsets = [7, 0], sizes = [1, 128], strides = [1, 1]} : vector<9x128xf32> to vector<1x128xf32>
    %55 = vector.shape_cast %54 : vector<1x128xf32> to vector<128xf32>
    %56 = vector.shape_cast %55 : vector<128xf32> to vector<1x1x1x128xf32>
    %57 = vector.extract_strided_slice %0 {offsets = [0, 2, 1, 0], sizes = [1, 16, 16, 128], strides = [1, 1, 1, 1]} : vector<1x18x18x128xf32> to vector<1x16x16x128xf32>
    %58 = vector.broadcast %56 : vector<1x1x1x128xf32> to vector<1x16x16x128xf32>
    %59 = arith.mulf %57, %58 : vector<1x16x16x128xf32>
    %60 = arith.addf %53, %59 : vector<1x16x16x128xf32>
    %61 = vector.extract_strided_slice %1 {offsets = [8, 0], sizes = [1, 128], strides = [1, 1]} : vector<9x128xf32> to vector<1x128xf32>
    %62 = vector.shape_cast %61 : vector<1x128xf32> to vector<128xf32>
    %63 = vector.shape_cast %62 : vector<128xf32> to vector<1x1x1x128xf32>
    %64 = vector.extract_strided_slice %0 {offsets = [0, 2, 2, 0], sizes = [1, 16, 16, 128], strides = [1, 1, 1, 1]} : vector<1x18x18x128xf32> to vector<1x16x16x128xf32>
    %65 = vector.broadcast %63 : vector<1x1x1x128xf32> to vector<1x16x16x128xf32>
    %66 = arith.mulf %64, %65 : vector<1x16x16x128xf32>
    %67 = arith.addf %60, %66 : vector<1x16x16x128xf32>
    %68 = vector.shape_cast %67 : vector<1x16x16x128xf32> to vector<256x128xf32>
    %69 = arith.truncf %68 : vector<256x128xf32> to vector<256x128xbf16>
    %c0_7 = arith.constant 0 : index
    %c0_8 = arith.constant 0 : index
    %70 = vector.load %arg4[%c0_7, %c0_8] : memref<128x128xbf16, #tpu.memory_space<vmem>>, vector<128x128xbf16>
    %cst = arith.constant dense<0.000000e+00> : vector<256x128xf32>
    %71 = tpu.matmul %69, %70, %cst {dimension_numbers = #tpu.dot_dimension_numbers<[1], [0], [0], [1], [0, 0, 1, 1], [], []>} : vector<256x128xbf16>, vector<128x128xbf16>, vector<256x128xf32> -> vector<256x128xf32>
    %c0_9 = arith.constant 0 : index
    %c0_10 = arith.constant 0 : index
    %72 = vector.load %arg5[%c0_9, %c0_10] : memref<1x128xf32, #tpu.memory_space<vmem>>, vector<1x128xf32>
    %73 = vector.broadcast %72 : vector<1x128xf32> to vector<256x128xf32>
    %74 = arith.addf %71, %73 : vector<256x128xf32>
    %75 = vector.shape_cast %74 : vector<256x128xf32> to vector<1x16x16x128xf32>
    %c0_11 = arith.constant 0 : index
    %c0_12 = arith.constant 0 : index
    %c0_13 = arith.constant 0 : index
    %c0_14 = arith.constant 0 : index
    %76 = vector.load %arg6[%c0_11, %c0_12, %c0_13, %c0_14] : memref<1x16x16x128xf32, #tpu.memory_space<vmem>>, vector<1x16x16x128xf32>
    tpu.vector_store %arg6[%c0_11, %c0_12, %c0_13, %c0_14], %75 {strides = array<i32>} : memref<1x16x16x128xf32, #tpu.memory_space<vmem>>, vector<1x16x16x128xf32>,
    return
  }
  func.func @transform_0(%arg0: i32) -> (i32, i32, i32, i32) {
    %c0_i32 = arith.constant 0 : i32
    %c0_i32_0 = arith.constant 0 : i32
    %c0_i32_1 = arith.constant 0 : i32
    %c0_i32_2 = arith.constant 0 : i32
    return %arg0, %c0_i32, %c0_i32_0, %c0_i32_1 : i32, i32, i32, i32
  }
  func.func @transform_1(%arg0: i32) -> (i32, i32) {
    %c0_i32 = arith.constant 0 : i32
    %c0_i32_0 = arith.constant 0 : i32
    %c0_i32_1 = arith.constant 0 : i32
    return %c0_i32, %c0_i32_0 : i32, i32
  }
  func.func @transform_2(%arg0: i32) -> (i32, i32) {
    %c0_i32 = arith.constant 0 : i32
    %c0_i32_0 = arith.constant 0 : i32
    %c0_i32_1 = arith.constant 0 : i32
    return %c0_i32, %c0_i32_0 : i32, i32
  }
  func.func @transform_3(%arg0: i32) -> (i32, i32) {
    %c0_i32 = arith.constant 0 : i32
    %c0_i32_0 = arith.constant 0 : i32
    %c0_i32_1 = arith.constant 0 : i32
    return %c0_i32, %c0_i32_0 : i32, i32
  }
  func.func @transform_4(%arg0: i32) -> (i32, i32) {
    %c0_i32 = arith.constant 0 : i32
    %c0_i32_0 = arith.constant 0 : i32
    %c0_i32_1 = arith.constant 0 : i32
    return %c0_i32, %c0_i32_0 : i32, i32
  }
  func.func @transform_5(%arg0: i32) -> (i32, i32, i32, i32) {
    %c0_i32 = arith.constant 0 : i32
    %c0_i32_0 = arith.constant 0 : i32
    %c0_i32_1 = arith.constant 0 : i32
    %c0_i32_2 = arith.constant 0 : i32
    return %arg0, %c0_i32, %c0_i32_0, %c0_i32_1 : i32, i32, i32, i32
  }
}

</mosaic_0001>

<bundles_post_ra>
// kernel: dsc_forward.1
= control target key start
LH: loop header
LB: loop body
LE: loop exit
PB: predicated region body
PF: predicated region fallthrough
CT: control target
= control target key end

     0   :  { %10 = vsyncpa [#allocation3], 0  ;;  %s3987_s0 = inlined_call_operand.vmem [shape: f32[2,18,18,128], index: 0, kind: input, shape index: {}]   ;;  %s3988_s1 = inlined_call_operand.vmem [shape: f32[9,128], index: 1, kind: input, shape index: {}]   ;;  %s3989_s2 = inlined_call_operand.vmem [shape: f32[1,128], index: 2, kind: input, shape index: {}]   ;;  %s3990_s3 = inlined_call_operand.vmem [shape: bf16[128,128], index: 3, kind: input, shape index: {}]   ;;  %s3991_s4 = inlined_call_operand.vmem [shape: f32[1,128], index: 4, kind: input, shape index: {}]   ;;  %s3992_s5 = inlined_call_operand.hbm [shape: f32[2,16,16,128], index: 5, kind: output, shape index: {}]  }
   0x1   :  { %12 = vsyncpa [#allocation3 + $0x1], 0  ;;  %s2581_s18 = smov 0   ;;  %s2583_s19 = smov 0  }
   0x2   :  { %s2585_s20 = smov 0   ;;  %s2587_s21 = smov 0  }
   0x3 LB: > { %s2602_s22 = sadd.s32 4294967295, %s2546_s21   ;;  %s2313_s23 = sadd.s32 4294967294, %s2546_s21   ;;  %s2546_s21 = sphi %s2587_s21, %s3998_s21   ;;  %s2542_s20 = sphi %s2585_s20, %s3997_s20   ;;  %s2538_s19 = sphi %s2583_s19, %s3996_s19   ;;  %s2534_s18 = sphi %s2581_s18, %s3995_s18  }
   0x4   : > { %s2606_s24 = sadd.s32 1, %s2546_s21   ;;  %s135_s25 = sadd.s32 1, %s2542_s20 }
   0x5   : > { %s132_s26 = ssub.s32 %s2546_s21, %s2606_s24  ;;  %p145_p0 = scmp.ne.s32.totalorder %s2542_s20, %s2538_s19 }
   0x6   : > { %p133_p1 = scmp.eq.s32.totalorder %s132_s26, 0  ;;  %p146_p2 = scmp.eq.s32.totalorder %s2602_s22, 1 }
   0x7   : > { %p151_p3 = scmp.ne.s32.totalorder %s2538_s19, %s2534_s18  ;;  %p152_p4 = scmp.eq.s32.totalorder %s2313_s23, 1 }
   0x8   : > { %s2617_s27 = scalar_select %p133_p1, %s2542_s20, %s135_s25  }
   0x9   : > { %p2619_p5 = por %p146_p2, %p145_p0  ;;  %p2623_p6 = por %p152_p4, %p151_p3 }
   0xa   : > { %p2316_p7 = scmp.ge.s32.totalorder %s2546_s21, 1  ;;  %p190_p8 = scmp.lt.s32.totalorder %s2546_s21, 3 }
   0xc   : > { %p191_p9 = pnand %p2316_p7, %p190_p8 }
   0xd   : > { %v2466_v0 = vld [vmem:[%s3990_s3] sm:$0xff] (!%p191_p9)   ;;  %p218_p10 = scmp.lt.s32.totalorder (!%p191_p9), %s2602_s22, 1  ;;  %v281_v1 = vlaneseq (!%p191_p9)  ;;  %v2467_v2 = vld [vmem:[%s3990_s3 + $0x8] sm:$0xff] (!%p191_p9)   ;;  %v2468_v3 = vld [vmem:[%s3990_s3 + $0x10] sm:$0xff] (!%p191_p9)   ;;  %vm455_vm0 = vcmask (!%p191_p9), 1046528   ;;  %vm700_vm1 = vcmask (!%p191_p9), 1045504  }
   0xe   : > { %194 = sbr.rel (%p191_p9) target bundleno = 557 (0x22d), region = 40  ;;  %2360 = vmatprep.subr.bf16.mxu0 (!%p191_p9), %v2466_v0  ;;  %2408 = vmatprep.subr.bf16.mxu1 (!%p191_p9), %v2466_v0  ;;  %v2469_v5 = vld [vmem:[%s3990_s3 + $0x18] sm:$0xff] (!%p191_p9)   ;;  %v2661_v14 = vld [vmem:[%s3988_s1] sm:$0xff] (!%p191_p9)  ;;  %v2471_v33 = vld [vmem:[%s3990_s3 + $0x28] sm:$0xff] (!%p191_p9)   ;;  %s2335_s13 = sshll.u32 (!%p191_p9), %s2602_s22, 12 }
   0xf   : > { %2361 = vmatpush3.bf16.msra.mxu0 (!%p191_p9), %v2466_v0  ;;  %2416 = vmatpush3.bf16.msra.mxu1 (!%p191_p9), %v2466_v0  ;;  %v2640_v4 = vshrl.u32 (!%p191_p9), %v281_v1, 7  ;;  %v2470_v16 = vld [vmem:[%s3990_s3 + $0x20] sm:$0xff] (!%p191_p9)   ;;  %v2472_v52 = vld [vmem:[%s3990_s3 + $0x30] sm:$0xff] (!%p191_p9)   ;;  %s3936_s23 = scalar_lea.hbm (!%p191_p9), %s3992_s5, %s2335_s13  ;;  %s2548_s26 = smov (!%p191_p9), [#allocation2]  }
  0x10   : > { %2362 = vmatprep.subr.bf16.mxu0 (!%p191_p9), %v2467_v2  ;;  %2409 = vmatprep.subr.bf16.mxu1 (!%p191_p9), %v2467_v2  ;;  %v2680_v21 = vld [vmem:[%s3989_s2] ss:$0 sm:$0xff] (!%p191_p9)  ;;  %s2488_s30 = sshll.u32 (!%p191_p9), %s2548_s26, 4  ;;  %s2489_s30 = int_to_ptr.vmem [resolvable:$false] %s2488_s30 }
  0x11   : > { %v283_v6 = vsub.s32 (!%p191_p9), 0, %v2640_v4  ;;  %v357_v7 = vsub.s32 (!%p191_p9), 1, %v2640_v4  ;;  %v602_v8 = vsub.s32 (!%p191_p9), 2, %v2640_v4  ;;  %v847_v9 = vsub.s32 (!%p191_p9), 3, %v2640_v4  ;;  %s2490_s6 = scalar_lea.vmem (!%p191_p9), %s2489_s30, 8192 }
  0x12   : > { %v915_v10 = vsub.s32 (!%p191_p9), 4, %v2640_v4  ;;  %v1159_v11 = vsub.s32 (!%p191_p9), 5, %v2640_v4  ;;  %v1403_v15 = vsub.s32 (!%p191_p9), 6, %v2640_v4  ;;  %v1471_v56 = vsub.s32 (!%p191_p9), 7, %v2640_v4 }
  0x13   : > { %2363 = vmatpush3.bf16.msra.mxu0 (!%p191_p9), %v2467_v2  ;;  %2417 = vmatpush3.bf16.msra.mxu1 (!%p191_p9), %v2467_v2  ;;  %v2669_v18 = vrot.slane (!%p191_p9), %v2661_v14, %v283_v6  ;;  %v2672_v19 = vrot.slane (!%p191_p9), %v2661_v14, %v357_v7  ;;  %v2675_v20 = vrot.slane (!%p191_p9), %v2661_v14, %v602_v8  ;;  %v2473_v6 = vld [vmem:[%s3990_s3 + $0x38] sm:$0xff] (!%p191_p9)   ;;  %v2751_v7 = vld [vmem:[%s3988_s1 + $0x8] ss:$0 sm:$0xff] (!%p191_p9) }
  0x14   : > { %2364 = vmatprep.subr.bf16.mxu0 (!%p191_p9), %v2468_v3  ;;  %2410 = vmatprep.subr.bf16.mxu1 (!%p191_p9), %v2468_v3  ;;  %v2683_v22 = vrot.slane (!%p191_p9), %v2661_v14, %v847_v9  ;;  %v2686_v23 = vrot.slane (!%p191_p9), %v2661_v14, %v915_v10  ;;  %v2689_v24 = vrot.slane (!%p191_p9), %v2661_v14, %v1159_v11 }
  0x15   : > { %s219_s9 = scalar_select %p218_p10, %s2602_s22, 1  ;;  %v2699_v32 = vrot.slane %v2661_v14, %v1403_v15 }
  0x17   : > { %s2424_s12 = smul.u32 432, %s219_s9  ;;  %2365 = vmatpush3.bf16.msra.mxu0 %v2468_v3  ;;  %2418 = vmatpush3.bf16.msra.mxu1 %v2468_v3  ;;  %s215_s9 = sand.u32 1, %s2538_s19  }
  0x18   : > { %2366 = vmatprep.subr.bf16.mxu0 %v2469_v5  ;;  %2411 = vmatprep.subr.bf16.mxu1 %v2469_v5  ;;  %s3946_s22 = scalar_lea.sflag [#allocation3], %s215_s9 }
  0x19   : > { %s2648_s17 = scalar_lea.vmem %s3987_s0, %s2424_s12 }
  0x1a   : > { %v224_v12 = vld [vmem:[%s2648_s17] sm:$0xff]  ;;  %v225_v13 = vld [vmem:[%s2648_s17 + $0x8] sm:$0xff]  ;;  %v226_v17 = vld [vmem:[%s2648_s17 + $0x10] sm:$0x3] }
  0x1b   : > { %v229_v25 = vld [vmem:[%s2648_s17 + $0x28] sm:$0x3]  ;;  %v285_v26 = vmul.f32 %v2669_v18, %v224_v12  ;;  %v286_v27 = vmul.f32 %v2669_v18, %v225_v13  ;;  %v359_v28 = vmul.f32 %v2672_v19, %v224_v12  ;;  %v360_v29 = vmul.f32 %v2672_v19, %v225_v13  ;;  %2367 = vmatpush3.bf16.msra.mxu0 %v2469_v5  ;;  %v2707_v38 = vld [vmem:[%s2648_s17 + $0x18] sm:$0xff]  ;;  %v2721_v47 = vld [vmem:[%s2648_s17 + $0x20] sm:$0xff] }
  0x1c   : > { %2419 = vmatpush3.bf16.msra.mxu1 %v2469_v5  ;;  %v361_v30 = vmul.f32 %v2672_v19, %v226_v17  ;;  %v604_v31 = vmul.f32 %v2675_v20, %v224_v12  ;;  %2368 = vmatprep.subr.bf16.mxu0 %v2470_v16  ;;  %v2710_v39 = vmul.f32 %v2672_v19, %v229_v25  ;;  %v2740_v1 = vld [vmem:[%s2648_s17 + $0x30] sm:$0xff]  ;;  %v2756_v12 = vld [vmem:[%s2648_s17 + $0x38] sm:$0xff] }
  0x1d   : > { %2412 = vmatprep.subr.bf16.mxu1 %v2470_v16  ;;  %v323_v34 = vadd.f32 %v2680_v21, %v285_v26  ;;  %v324_v35 = vadd.f32 %v2680_v21, %v286_v27  ;;  %v456_v36 = vrot.slane %v359_v28, 1  ;;  %v457_v37 = vrot.slane %v360_v29, 1 }
  0x1e   : > { %v459_v40 = vrot.slane %v361_v30, 1  ;;  %v605_v41 = vmul.f32 %v2675_v20, %v225_v13  ;;  %v606_v42 = vmul.f32 %v2675_v20, %v226_v17  ;;  %v2716_v44 = vmul.f32 %v2675_v20, %v229_v25 }
  0x1f   : > { %v458_v43 = vsel %vm455_vm0, %v456_v36, %v457_v37  ;;  %v701_v45 = vrot.slane %v604_v31, 2  ;;  %v849_v46 = vmul.f32 %v2683_v22, %v2707_v38  ;;  %2369 = vmatpush3.bf16.msra.mxu0 %v2470_v16  ;;  %v850_v54 = vmul.f32 %v2683_v22, %v2721_v47 }
  0x20   : > { %2420 = vmatpush3.bf16.msra.mxu1 %v2470_v16  ;;  %v460_v48 = vsel %vm455_vm0, %v457_v37, %v459_v40  ;;  %v568_v49 = vadd.f32 %v458_v43, %v323_v34  ;;  %v702_v50 = vrot.slane %v605_v41, 2  ;;  %v704_v51 = vrot.slane %v606_v42, 2  ;;  %2370 = vmatprep.subr.bf16.mxu0 %v2471_v33  ;;  %v2771_v34 = vld [vmem:[%s2648_s17 + $0x40] sm:$0x3] }
  0x21   : > { %2413 = vmatprep.subr.bf16.mxu1 %v2471_v33  ;;  %v569_v53 = vadd.f32 %v460_v48, %v324_v35  ;;  %v917_v55 = vmul.f32 %v2686_v23, %v2707_v38  ;;  %v918_v59 = vmul.f32 %v2686_v23, %v2721_v47  ;;  %v919_v60 = vmul.f32 %v2686_v23, %v229_v25 }
  0x22   : > { %v703_v57 = vsel %vm700_vm1, %v701_v45, %v702_v50  ;;  %v705_v58 = vsel %vm700_vm1, %v702_v50, %v704_v51  ;;  %v1161_v0 = vmul.f32 %v2689_v24, %v2707_v38  ;;  %v1162_v4 = vmul.f32 %v2689_v24, %v2721_v47  ;;  %v248_v45 = vld [vmem:[%s2648_s17 + $0xc0] sm:$0xff] }
  0x23   : > { %v813_v61 = vadd.f32 %v703_v57, %v568_v49  ;;  %v814_v62 = vadd.f32 %v705_v58, %v569_v53  ;;  %v1013_v63 = vrot.slane %v917_v55, 1  ;;  %2371 = vmatpush3.bf16.msra.mxu0 %v2471_v33  ;;  %v1014_v2 = vrot.slane %v918_v59, 1 }
  0x24   : > { %2421 = vmatpush3.bf16.msra.mxu1 %v2471_v33  ;;  %v1016_v3 = vrot.slane %v919_v60, 1  ;;  %v1163_v5 = vmul.f32 %v2689_v24, %v229_v25  ;;  %2372 = vmatprep.subr.bf16.mxu0 %v2472_v52  ;;  %v1257_v10 = vrot.slane %v1161_v0, 2  ;;  %v1405_v11 = vmul.f32 %v2699_v32, %v2740_v1 }
  0x25   : > { %2414 = vmatprep.subr.bf16.mxu1 %v2472_v52  ;;  %v881_v8 = vadd.f32 %v849_v46, %v813_v61  ;;  %v882_v9 = vadd.f32 %v850_v54, %v814_v62  ;;  %v1015_v13 = vsel %vm455_vm0, %v1013_v63, %v1014_v2  ;;  %v1258_v16 = vrot.slane %v1162_v4, 2  ;;  %v249_v46 = vld [vmem:[%s2648_s17 + $0xc8] sm:$0xff] }
  0x26   : > { %v1017_v15 = vsel %vm455_vm0, %v1014_v2, %v1016_v3  ;;  %v1260_v17 = vrot.slane %v1163_v5, 2  ;;  %v1406_v27 = vmul.f32 %v2699_v32, %v2756_v12  ;;  %v2763_v28 = vrot.slane %v2661_v14, %v1471_v56  ;;  %v250_v56 = vld [vmem:[%s2648_s17 + $0xd0] sm:$0x3] }
  0x27   : > { %v1125_v25 = vadd.f32 %v1015_v13, %v881_v8  ;;  %v1126_v26 = vadd.f32 %v1017_v15, %v882_v9  ;;  %2373 = vmatpush3.bf16.msra.mxu0 %v2472_v52  ;;  %v464_v29 = vrot.slane %v2710_v39, 1  ;;  %v1259_v30 = vsel %vm700_vm1, %v1257_v10, %v1258_v16  ;;  %v2800_v15 = vld [vmem:[%s2648_s17 + $0xd8] sm:$0xff] }
  0x28   : > { %2422 = vmatpush3.bf16.msra.mxu1 %v2472_v52  ;;  %v1261_v31 = vsel %vm700_vm1, %v1258_v16, %v1260_v17  ;;  %v1717_v33 = vmul.f32 %v2751_v7, %v2740_v1  ;;  %2374 = vmatprep.subr.bf16.mxu0 %v2473_v6  ;;  %v709_v14 = vrot.slane %v2716_v44, 2  ;;  %v1473_v37 = vmul.f32 %v2763_v28, %v2740_v1 }
  0x29   : > { %2415 = vmatprep.subr.bf16.mxu1 %v2473_v6  ;;  %v1369_v35 = vadd.f32 %v1259_v30, %v1125_v25  ;;  %v1370_v36 = vadd.f32 %v1261_v31, %v1126_v26  ;;  %v1474_v40 = vmul.f32 %v2763_v28, %v2756_v12  ;;  %v1475_v41 = vmul.f32 %v2763_v28, %v2771_v34 }
  0x2a   : > { %v1718_v42 = vmul.f32 %v2751_v7, %v2756_v12  ;;  %v1719_v43 = vmul.f32 %v2751_v7, %v2771_v34  ;;  %v1569_v50 = vrot.slane %v1473_v37, 1  ;;  %v1813_v51 = vrot.slane %v1717_v33, 2  ;;  %v2808_v33 = vld [vmem:[%s2648_s17 + $0xe0] sm:$0xff] }
  0x2b   : > { %v1437_v48 = vadd.f32 %v1405_v11, %v1369_v35  ;;  %v1438_v49 = vadd.f32 %v1406_v27, %v1370_v36  ;;  %2375 = vmatpush3.bf16.msra.mxu0 %v2473_v6  ;;  %v1570_v52 = vrot.slane %v1474_v40, 1  ;;  %v1572_v53 = vrot.slane %v1475_v41, 1  ;;  %v2811_v40 = vld [vmem:[%s2648_s17 + $0xe8] sm:$0x3] }
  0x2c   : > { %2423 = vmatpush3.bf16.msra.mxu1 %v2473_v6  ;;  %v1814_v54 = vrot.slane %v1718_v42, 2  ;;  %v1816_v55 = vrot.slane %v1719_v43, 2  ;;  %v301_v57 = vmul.f32 %v2669_v18, %v248_v45  ;;  %v302_v58 = vmul.f32 %v2669_v18, %v249_v46 }
  0x2d   : > { %v383_v59 = vmul.f32 %v2672_v19, %v248_v45  ;;  %v384_v60 = vmul.f32 %v2672_v19, %v249_v46  ;;  %v1571_v61 = vsel %vm455_vm0, %v1569_v50, %v1570_v52  ;;  %v1573_v62 = vsel %vm455_vm0, %v1570_v52, %v1572_v53 }
  0x2e   : > { %v1815_v63 = vsel %vm700_vm1, %v1813_v51, %v1814_v54  ;;  %v1817_v0 = vsel %vm700_vm1, %v1814_v54, %v1816_v55  ;;  %v1681_v2 = vadd.f32 %v1571_v61, %v1437_v48  ;;  %v1682_v3 = vadd.f32 %v1573_v62, %v1438_v49  ;;  %v2827_v55 = vld [vmem:[%s2648_s17 + $0xf0] sm:$0xff] }
  0x2f   : > { %v339_v4 = vadd.f32 %v2680_v21, %v301_v57  ;;  %v340_v5 = vadd.f32 %v2680_v21, %v302_v58  ;;  %v385_v6 = vmul.f32 %v2672_v19, %v250_v56  ;;  %v496_v8 = vrot.slane %v383_v59, 1 }
  0x30   : > { %v497_v9 = vrot.slane %v384_v60, 1  ;;  %v628_v10 = vmul.f32 %v2675_v20, %v248_v45  ;;  %v1925_v11 = vadd.f32 %v1815_v63, %v1681_v2  ;;  %v1926_v13 = vadd.f32 %v1817_v0, %v1682_v3  ;;  %v2837_v0 = vld [vmem:[%s2648_s17 + $0xf8] sm:$0xff] }
  0x31   : > { %v629_v16 = vmul.f32 %v2675_v20, %v249_v46  ;;  %v630_v17 = vmul.f32 %v2675_v20, %v250_v56  ;;  %v499_v26 = vrot.slane %v385_v6, 1  ;;  %v865_v30 = vmul.f32 %v2683_v22, %v2800_v15  ;;  %v2841_v6 = vld [vmem:[%s2648_s17 + $0x100] sm:$0x3] }
  0x32   : > { %v498_v25 = vsel %vm455_vm0, %v496_v8, %v497_v9  ;;  %v741_v27 = vrot.slane %v628_v10, 2  ;;  %v1957_v31 = vpack.c.bf16 %v1926_v13, %v1925_v11  ;;  %v866_v42 = vmul.f32 %v2683_v22, %v2808_v33 }
  0x33   : > { %v584_v35 = vadd.f32 %v498_v25, %v339_v4  ;;  %v742_v36 = vrot.slane %v629_v16, 2  ;;  %v744_v37 = vrot.slane %v630_v17, 2  ;;  %v500_v41 = vsel %vm455_vm0, %v497_v9, %v499_v26 }
  0x34   : > { %v941_v43 = vmul.f32 %v2686_v23, %v2800_v15  ;;  %v942_v45 = vmul.f32 %v2686_v23, %v2808_v33  ;;  %2376 = vmatprep.mubr.bf16.mxu0 %v1957_v31  ;;  %v585_v46 = vadd.f32 %v500_v41, %v340_v5  ;;  %v943_v50 = vmul.f32 %v2686_v23, %v2811_v40 }
  0x35   : > { %v743_v48 = vsel %vm700_vm1, %v741_v27, %v742_v36  ;;  %v745_v49 = vsel %vm700_vm1, %v742_v36, %v744_v37  ;;  %v1185_v54 = vmul.f32 %v2689_v24, %v2800_v15  ;;  %v1186_v58 = vmul.f32 %v2689_v24, %v2808_v33 }
  0x36   : > { %v829_v51 = vadd.f32 %v743_v48, %v584_v35  ;;  %v1053_v52 = vrot.slane %v941_v43, 1  ;;  %v1054_v53 = vrot.slane %v942_v45, 1  ;;  %v830_v56 = vadd.f32 %v745_v49, %v585_v46 }
  0x37   : > { %v1056_v57 = vrot.slane %v943_v50, 1  ;;  %v1187_v59 = vmul.f32 %v2689_v24, %v2811_v40  ;;  %v1297_v62 = vrot.slane %v1185_v54, 2  ;;  %v1421_v63 = vmul.f32 %v2699_v32, %v2827_v55 }
  0x38   : > { %v897_v60 = vadd.f32 %v865_v30, %v829_v51  ;;  %v1055_v61 = vsel %vm455_vm0, %v1053_v52, %v1054_v53  ;;  %v898_v2 = vadd.f32 %v866_v42, %v830_v56  ;;  %v1298_v4 = vrot.slane %v1186_v58, 2 }
  0x39   : > { %v1057_v3 = vsel %vm455_vm0, %v1054_v53, %v1056_v57  ;;  %v1300_v5 = vrot.slane %v1187_v59, 2  ;;  %v1422_v9 = vmul.f32 %v2699_v32, %v2837_v0  ;;  %v1497_v10 = vmul.f32 %v2763_v28, %v2827_v55 }
  0x3a   : > { %v1141_v8 = vadd.f32 %v1055_v61, %v897_v60  ;;  %v1498_v11 = vmul.f32 %v2763_v28, %v2837_v0  ;;  %v1142_v13 = vadd.f32 %v1057_v3, %v898_v2  ;;  %v1299_v16 = vsel %vm700_vm1, %v1297_v62, %v1298_v4 }
  0x3b   : > { %v1301_v17 = vsel %vm700_vm1, %v1298_v4, %v1300_v5  ;;  %v1499_v25 = vmul.f32 %v2763_v28, %v2841_v6  ;;  %v1609_v27 = vrot.slane %v1497_v10, 1  ;;  %v1741_v31 = vmul.f32 %v2751_v7, %v2827_v55 }
  0x3c   : > { %v1385_v26 = vadd.f32 %v1299_v16, %v1141_v8  ;;  %v1610_v30 = vrot.slane %v1498_v11, 1  ;;  %v1386_v35 = vadd.f32 %v1301_v17, %v1142_v13  ;;  %v1742_v37 = vmul.f32 %v2751_v7, %v2837_v0 }
  0x3d   : > { %v1612_v36 = vrot.slane %v1499_v25, 1  ;;  %v1743_v41 = vmul.f32 %v2751_v7, %v2841_v6  ;;  %v1853_v45 = vrot.slane %v1741_v31, 2  ;;  %v287_v46 = vmul.f32 %v2669_v18, %v2707_v38 }
  0x3e   : > { %v1453_v42 = vadd.f32 %v1421_v63, %v1385_v26  ;;  %v1611_v43 = vsel %vm455_vm0, %v1609_v27, %v1610_v30  ;;  %v1454_v48 = vadd.f32 %v1422_v9, %v1386_v35  ;;  %v1854_v50 = vrot.slane %v1742_v37, 2 }
  0x3f   : > { %v1613_v49 = vsel %vm455_vm0, %v1610_v30, %v1612_v36  ;;  %v1856_v51 = vrot.slane %v1743_v41, 2  ;;  %v288_v53 = vmul.f32 %v2669_v18, %v2721_v47  ;;  %v325_v54 = vadd.f32 %v2680_v21, %v287_v46 }
  0x40   : > { %v1697_v52 = vadd.f32 %v1611_v43, %v1453_v42  ;;  %v362_v56 = vmul.f32 %v2672_v19, %v2707_v38  ;;  %v1698_v57 = vadd.f32 %v1613_v49, %v1454_v48  ;;  %v1855_v58 = vsel %vm700_vm1, %v1853_v45, %v1854_v50  ;;  %v2908_v48 = vld [vmem:[%s2648_s17 + $0x50] sm:$0xff] }
  0x41   : > { %v1857_v59 = vsel %vm700_vm1, %v1854_v50, %v1856_v51  ;;  %v363_v60 = vmul.f32 %v2672_v19, %v2721_v47  ;;  %v326_v62 = vadd.f32 %v2680_v21, %v288_v53  ;;  %v607_v2 = vmul.f32 %v2675_v20, %v2707_v38  ;;  %v2912_v53 = vld [vmem:[%s2648_s17 + $0x58] sm:$0x3] }
  0x42   : > { %v1941_v61 = vadd.f32 %v1855_v58, %v1697_v52  ;;  %v461_v63 = vrot.slane %v362_v56, 1  ;;  %v1942_v3 = vadd.f32 %v1857_v59, %v1698_v57  ;;  %v608_v5 = vmul.f32 %v2675_v20, %v2721_v47 }
  0x43   : > { %v462_v4 = vrot.slane %v363_v60, 1  ;;  %v851_v8 = vmul.f32 %v2683_v22, %v2740_v1  ;;  %v706_v9 = vrot.slane %v607_v2, 2  ;;  %v852_v10 = vmul.f32 %v2683_v22, %v2756_v12 }
  0x44   : > { %v920_v11 = vmul.f32 %v2686_v23, %v2740_v1  ;;  %v921_v13 = vmul.f32 %v2686_v23, %v2756_v12  ;;  %v1965_v38 = vpack.c.bf16 %v1942_v3, %v1941_v61  ;;  %v707_v17 = vrot.slane %v608_v5, 2 }
  0x45   : > { %v463_v16 = vsel %vm455_vm0, %v461_v63, %v462_v4  ;;  %v465_v47 = vsel %vm455_vm0, %v462_v4, %v464_v29  ;;  %v922_v27 = vmul.f32 %v2686_v23, %v2771_v34  ;;  %v1164_v39 = vmul.f32 %v2689_v24, %v2740_v1  ;;  %v2898_v29 = vld [vmem:[%s2648_s17 + $0x48] sm:$0xff] }
  0x46   : > { %v570_v25 = vadd.f32 %v463_v16, %v325_v54  ;;  %v571_v26 = vadd.f32 %v465_v47, %v326_v62  ;;  %v1018_v30 = vrot.slane %v920_v11, 1  ;;  %2392 = vmatprep.mubr.bf16.mxu1 %v1965_v38  ;;  %v708_v31 = vsel %vm700_vm1, %v706_v9, %v707_v17 }
  0x47   : > { %v710_v35 = vsel %vm700_vm1, %v707_v17, %v709_v14  ;;  %v1019_v36 = vrot.slane %v921_v13, 1  ;;  %v1021_v42 = vrot.slane %v922_v27, 1  ;;  %v1165_v43 = vmul.f32 %v2689_v24, %v2756_v12 }
  0x48   : > { %v815_v37 = vadd.f32 %v708_v31, %v570_v25  ;;  %v816_v41 = vadd.f32 %v710_v35, %v571_v26  ;;  %v1166_v44 = vmul.f32 %v2689_v24, %v2771_v34  ;;  %v1262_v46 = vrot.slane %v1164_v39, 2 }
  0x49   : > { %v1020_v45 = vsel %vm455_vm0, %v1018_v30, %v1019_v36  ;;  %v1407_v14 = vmul.f32 %v2699_v32, %v2898_v29  ;;  %v1022_v51 = vsel %vm455_vm0, %v1019_v36, %v1021_v42  ;;  %v1263_v52 = vrot.slane %v1165_v43, 2 }
  0x4a   : > { %v883_v49 = vadd.f32 %v851_v8, %v815_v37  ;;  %v884_v50 = vadd.f32 %v852_v10, %v816_v41  ;;  %v1265_v54 = vrot.slane %v1166_v44, 2  ;;  %v1408_v56 = vmul.f32 %v2699_v32, %v2908_v48 }
  0x4b   : > { %v1476_v57 = vmul.f32 %v2763_v28, %v2898_v29  ;;  %v1477_v58 = vmul.f32 %v2763_v28, %v2908_v48  ;;  %v1264_v61 = vsel %vm700_vm1, %v1262_v46, %v1263_v52  ;;  %v1478_v62 = vmul.f32 %v2763_v28, %v2912_v53 }
  0x4c   : > { %v1127_v59 = vadd.f32 %v1020_v45, %v883_v49  ;;  %v1128_v60 = vadd.f32 %v1022_v51, %v884_v50  ;;  %v1266_v63 = vsel %vm700_vm1, %v1263_v52, %v1265_v54  ;;  %v1720_v4 = vmul.f32 %v2751_v7, %v2898_v29 }
  0x4d   : > { %v1574_v2 = vrot.slane %v1476_v57, 1  ;;  %v1575_v3 = vrot.slane %v1477_v58, 1  ;;  %v1577_v9 = vrot.slane %v1478_v62, 1  ;;  %v1721_v10 = vmul.f32 %v2751_v7, %v2908_v48 }
  0x4e   : > { %v1371_v5 = vadd.f32 %v1264_v61, %v1127_v59  ;;  %v1372_v8 = vadd.f32 %v1266_v63, %v1128_v60  ;;  %v1722_v13 = vmul.f32 %v2751_v7, %v2912_v53  ;;  %v1818_v38 = vrot.slane %v1720_v4, 2 }
  0x4f   : > { %v1576_v11 = vsel %vm455_vm0, %v1574_v2, %v1575_v3  ;;  %v303_v16 = vmul.f32 %v2669_v18, %v2800_v15  ;;  %v1578_v25 = vsel %vm455_vm0, %v1575_v3, %v1577_v9  ;;  %v1819_v26 = vrot.slane %v1721_v10, 2 }
  0x50   : > { %v1439_v47 = vadd.f32 %v1407_v14, %v1371_v5  ;;  %v1440_v17 = vadd.f32 %v1408_v56, %v1372_v8  ;;  %v1821_v27 = vrot.slane %v1722_v13, 2  ;;  %v304_v30 = vmul.f32 %v2669_v18, %v2808_v33 }
  0x51   : > { %v341_v31 = vadd.f32 %v2680_v21, %v303_v16  ;;  %v386_v35 = vmul.f32 %v2672_v19, %v2800_v15  ;;  %v1820_v37 = vsel %vm700_vm1, %v1818_v38, %v1819_v26  ;;  %v387_v41 = vmul.f32 %v2672_v19, %v2808_v33  ;;  %v2971_v16 = vld [vmem:[%s2648_s17 + $0x108] sm:$0xff] }
  0x52   : > { %v1683_v36 = vadd.f32 %v1576_v11, %v1439_v47  ;;  %v1684_v39 = vadd.f32 %v1578_v25, %v1440_v17  ;;  %v1822_v42 = vsel %vm700_vm1, %v1819_v26, %v1821_v27  ;;  %v342_v43 = vadd.f32 %v2680_v21, %v304_v30  ;;  %v2976_v27 = vld [vmem:[%s2648_s17 + $0x110] sm:$0xff] }
  0x53   : > { %v388_v45 = vmul.f32 %v2672_v19, %v2811_v40  ;;  %v501_v44 = vrot.slane %v386_v35, 1  ;;  %v502_v49 = vrot.slane %v387_v41, 1  ;;  %v631_v50 = vmul.f32 %v2675_v20, %v2800_v15 }
  0x54   : > { %v1927_v46 = vadd.f32 %v1820_v37, %v1683_v36  ;;  %v1928_v14 = vadd.f32 %v1822_v42, %v1684_v39  ;;  %v632_v52 = vmul.f32 %v2675_v20, %v2808_v33  ;;  %v633_v54 = vmul.f32 %v2675_v20, %v2811_v40 }
  0x55   : > { %v504_v51 = vrot.slane %v388_v45, 1  ;;  %v867_v56 = vmul.f32 %v2683_v22, %v2827_v55  ;;  %v503_v58 = vsel %vm455_vm0, %v501_v44, %v502_v49  ;;  %v746_v59 = vrot.slane %v631_v50, 2 }
  0x56   : > { %v1958_v57 = vpack.c.bf16 %v1928_v14, %v1927_v46  ;;  %v868_v60 = vmul.f32 %v2683_v22, %v2837_v0  ;;  %v586_v15 = vadd.f32 %v503_v58, %v341_v31  ;;  %v747_v62 = vrot.slane %v632_v52, 2 }
  0x57   : > { %v505_v61 = vsel %vm455_vm0, %v502_v49, %v504_v51  ;;  %v749_v63 = vrot.slane %v633_v54, 2  ;;  %v944_v40 = vmul.f32 %v2686_v23, %v2827_v55  ;;  %v945_v2 = vmul.f32 %v2686_v23, %v2837_v0 }
  0x58   : > { %2377 = vmatmul.mubr.bf16.vlgmr.msra.gmra.mrb[0].mxu0 %v1958_v57  ;;  %v587_v33 = vadd.f32 %v505_v61, %v342_v43  ;;  %v946_v3 = vmul.f32 %v2686_v23, %v2841_v6  ;;  %v748_v4 = vsel %vm700_vm1, %v746_v59, %v747_v62  ;;  %v1188_v8 = vmul.f32 %v2689_v24, %v2827_v55  ;;  %v2986_v43 = vld [vmem:[%s2648_s17 + $0x118] sm:$0x3] }
  0x59   : > { %v750_v5 = vsel %vm700_vm1, %v747_v62, %v749_v63  ;;  %v1189_v9 = vmul.f32 %v2689_v24, %v2837_v0  ;;  %v831_v10 = vadd.f32 %v748_v4, %v586_v15  ;;  %v1058_v13 = vrot.slane %v944_v40, 1 }
  0x5a   : > { %v832_v11 = vadd.f32 %v750_v5, %v587_v33  ;;  %v1059_v38 = vrot.slane %v945_v2, 1  ;;  %v1061_v47 = vrot.slane %v946_v3, 1  ;;  %v1190_v17 = vmul.f32 %v2689_v24, %v2841_v6 }
  0x5b   : > { %v1302_v25 = vrot.slane %v1188_v8, 2  ;;  %v1303_v26 = vrot.slane %v1189_v9, 2  ;;  %v899_v30 = vadd.f32 %v867_v56, %v831_v10  ;;  %v1423_v36 = vmul.f32 %v2699_v32, %v2971_v16 }
  0x5c   : > { %v900_v31 = vadd.f32 %v868_v60, %v832_v11  ;;  %v1060_v35 = vsel %vm455_vm0, %v1058_v13, %v1059_v38  ;;  %v1062_v39 = vsel %vm455_vm0, %v1059_v38, %v1061_v47  ;;  %v1305_v41 = vrot.slane %v1190_v17, 2 }
  0x5d   : > { %v1304_v37 = vsel %vm700_vm1, %v1302_v25, %v1303_v26  ;;  %v1424_v42 = vmul.f32 %v2699_v32, %v2976_v27  ;;  %v1143_v45 = vadd.f32 %v1060_v35, %v899_v30  ;;  %v1500_v46 = vmul.f32 %v2763_v28, %v2971_v16 }
  0x5e   : > { %v1144_v44 = vadd.f32 %v1062_v39, %v900_v31  ;;  %v1501_v14 = vmul.f32 %v2763_v28, %v2976_v27  ;;  %v1306_v49 = vsel %vm700_vm1, %v1303_v26, %v1305_v41  ;;  %v1502_v50 = vmul.f32 %v2763_v28, %v2986_v43 }
  0x5f   : > { %v1744_v51 = vmul.f32 %v2751_v7, %v2971_v16  ;;  %v1745_v52 = vmul.f32 %v2751_v7, %v2976_v27  ;;  %v1387_v54 = vadd.f32 %v1304_v37, %v1143_v45  ;;  %v1614_v57 = vrot.slane %v1500_v46, 1 }
  0x60   : > { %v1388_v56 = vadd.f32 %v1306_v49, %v1144_v44  ;;  %v1615_v58 = vrot.slane %v1501_v14, 1  ;;  %v1617_v59 = vrot.slane %v1502_v50, 1  ;;  %v1746_v60 = vmul.f32 %v2751_v7, %v2986_v43 }
  0x61   : > { %v1858_v61 = vrot.slane %v1744_v51, 2  ;;  %v1859_v15 = vrot.slane %v1745_v52, 2  ;;  %v1455_v62 = vadd.f32 %v1423_v36, %v1387_v54  ;;  %v289_v40 = vmul.f32 %v2669_v18, %v2740_v1 }
  0x62   : > { %v1456_v63 = vadd.f32 %v1424_v42, %v1388_v56  ;;  %v1616_v33 = vsel %vm455_vm0, %v1614_v57, %v1615_v58  ;;  %v1618_v2 = vsel %vm455_vm0, %v1615_v58, %v1617_v59  ;;  %v1861_v4 = vrot.slane %v1746_v60, 2 }
  0x63   : > { %v1860_v3 = vsel %vm700_vm1, %v1858_v61, %v1859_v15  ;;  %v290_v5 = vmul.f32 %v2669_v18, %v2756_v12  ;;  %v1699_v8 = vadd.f32 %v1616_v33, %v1455_v62  ;;  %v327_v10 = vadd.f32 %v2680_v21, %v289_v40 }
  0x64   : > { %v1700_v9 = vadd.f32 %v1618_v2, %v1456_v63  ;;  %v365_v11 = vmul.f32 %v2672_v19, %v2740_v1  ;;  %v1862_v13 = vsel %vm700_vm1, %v1859_v15, %v1861_v4  ;;  %v366_v47 = vmul.f32 %v2672_v19, %v2756_v12  ;;  %v3040_v15 = vld [vmem:[%s2648_s17 + $0x60] sm:$0xff]  ;;  %v3047_v2 = vld [vmem:[%s2648_s17 + $0x68] sm:$0xff] }
  0x65   : > { %v328_v38 = vadd.f32 %v2680_v21, %v290_v5  ;;  %v367_v17 = vmul.f32 %v2672_v19, %v2771_v34  ;;  %v1943_v25 = vadd.f32 %v1860_v3, %v1699_v8  ;;  %v610_v31 = vmul.f32 %v2675_v20, %v2740_v1 }
  0x66   : > { %v1944_v26 = vadd.f32 %v1862_v13, %v1700_v9  ;;  %v466_v30 = vrot.slane %v365_v11, 1  ;;  %v467_v35 = vrot.slane %v366_v47, 1  ;;  %v611_v39 = vmul.f32 %v2675_v20, %v2756_v12 }
  0x67   : > { %v469_v36 = vrot.slane %v367_v17, 1  ;;  %v612_v37 = vmul.f32 %v2675_v20, %v2771_v34  ;;  %v711_v42 = vrot.slane %v610_v31, 2  ;;  %v853_v45 = vmul.f32 %v2683_v22, %v2898_v29 }
  0x68   : > { %v1966_v41 = vpack.c.bf16 %v1944_v26, %v1943_v25  ;;  %v854_v44 = vmul.f32 %v2683_v22, %v2908_v48  ;;  %v468_v46 = vsel %vm455_vm0, %v466_v30, %v467_v35  ;;  %v712_v14 = vrot.slane %v611_v39, 2 }
  0x69   : > { %v470_v1 = vsel %vm455_vm0, %v467_v35, %v469_v36  ;;  %v714_v49 = vrot.slane %v612_v37, 2  ;;  %v572_v12 = vadd.f32 %v468_v46, %v327_v10  ;;  %v923_v34 = vmul.f32 %v2686_v23, %v2898_v29 }
  0x6a   : > { %2393 = vmatmul.mubr.bf16.vlgmr.msra.gmra.mrb[0].mxu1 %v1966_v41  ;;  %v573_v50 = vadd.f32 %v470_v1, %v328_v38  ;;  %v924_v51 = vmul.f32 %v2686_v23, %v2908_v48  ;;  %v713_v52 = vsel %vm700_vm1, %v711_v42, %v712_v14  ;;  %v925_v56 = vmul.f32 %v2686_v23, %v2912_v53  ;;  %v3056_v38 = vld [vmem:[%s2648_s17 + $0x70] sm:$0x3] }
  0x6b   : > { %v715_v54 = vsel %vm700_vm1, %v712_v14, %v714_v49  ;;  %v1167_v57 = vmul.f32 %v2689_v24, %v2898_v29  ;;  %v817_v58 = vadd.f32 %v713_v52, %v572_v12  ;;  %v1023_v60 = vrot.slane %v923_v34, 1 }
  0x6c   : > { %v818_v59 = vadd.f32 %v715_v54, %v573_v50  ;;  %v1024_v61 = vrot.slane %v924_v51, 1  ;;  %v1026_v62 = vrot.slane %v925_v56, 1  ;;  %v1168_v63 = vmul.f32 %v2689_v24, %v2908_v48 }
  0x6d   : > { %v1169_v33 = vmul.f32 %v2689_v24, %v2912_v53  ;;  %v1267_v40 = vrot.slane %v1167_v57, 2  ;;  %v885_v3 = vadd.f32 %v853_v45, %v817_v58  ;;  %v1409_v8 = vmul.f32 %v2699_v32, %v3040_v15 }
  0x6e   : > { %v886_v4 = vadd.f32 %v854_v44, %v818_v59  ;;  %v1025_v5 = vsel %vm455_vm0, %v1023_v60, %v1024_v61  ;;  %v1027_v9 = vsel %vm455_vm0, %v1024_v61, %v1026_v62  ;;  %v1268_v10 = vrot.slane %v1168_v63, 2 }
  0x6f   : > { %v1270_v11 = vrot.slane %v1169_v33, 2  ;;  %v1410_v13 = vmul.f32 %v2699_v32, %v3047_v2  ;;  %v1129_v47 = vadd.f32 %v1025_v5, %v885_v3  ;;  %v1479_v25 = vmul.f32 %v2763_v28, %v3040_v15 }
  0x70   : > { %v1130_v17 = vadd.f32 %v1027_v9, %v886_v4  ;;  %v1480_v26 = vmul.f32 %v2763_v28, %v3047_v2  ;;  %v1269_v30 = vsel %vm700_vm1, %v1267_v40, %v1268_v10  ;;  %v1481_v35 = vmul.f32 %v2763_v28, %v3056_v38 }
  0x71   : > { %v1271_v31 = vsel %vm700_vm1, %v1268_v10, %v1270_v11  ;;  %v1723_v36 = vmul.f32 %v2751_v7, %v3040_v15  ;;  %v1373_v39 = vadd.f32 %v1269_v30, %v1129_v47  ;;  %v1579_v41 = vrot.slane %v1479_v25, 1 }
  0x72   : > { %v1374_v37 = vadd.f32 %v1271_v31, %v1130_v17  ;;  %v1580_v42 = vrot.slane %v1480_v26, 1  ;;  %v1582_v45 = vrot.slane %v1481_v35, 1  ;;  %v1724_v44 = vmul.f32 %v2751_v7, %v3047_v2 }
  0x73   : > { %v1725_v46 = vmul.f32 %v2751_v7, %v3056_v38  ;;  %v1823_v1 = vrot.slane %v1723_v36, 2  ;;  %v1441_v14 = vadd.f32 %v1409_v8, %v1373_v39  ;;  %v305_v50 = vmul.f32 %v2669_v18, %v2827_v55 }
  0x74   : > { %v1442_v49 = vadd.f32 %v1410_v13, %v1374_v37  ;;  %v1581_v12 = vsel %vm455_vm0, %v1579_v41, %v1580_v42  ;;  %v1583_v34 = vsel %vm455_vm0, %v1580_v42, %v1582_v45  ;;  %v1824_v51 = vrot.slane %v1724_v44, 2 }
  0x75   : > { %v1826_v52 = vrot.slane %v1725_v46, 2  ;;  %v306_v54 = vmul.f32 %v2669_v18, %v2837_v0  ;;  %v1685_v56 = vadd.f32 %v1581_v12, %v1441_v14  ;;  %v343_v58 = vadd.f32 %v2680_v21, %v305_v50 }
  0x76   : > { %v1686_v57 = vadd.f32 %v1583_v34, %v1442_v49  ;;  %v389_v59 = vmul.f32 %v2672_v19, %v2827_v55  ;;  %v1825_v60 = vsel %vm700_vm1, %v1823_v1, %v1824_v51  ;;  %v390_v63 = vmul.f32 %v2672_v19, %v2837_v0  ;;  %v3111_v1 = vld [vmem:[%s2648_s17 + $0x120] sm:$0xff] }
  0x77   : > { %v1827_v61 = vsel %vm700_vm1, %v1824_v51, %v1826_v52  ;;  %v344_v62 = vadd.f32 %v2680_v21, %v306_v54  ;;  %v1929_v33 = vadd.f32 %v1825_v60, %v1685_v56  ;;  %v391_v3 = vmul.f32 %v2672_v19, %v2841_v6  ;;  %v3121_v56 = vld [vmem:[%s2648_s17 + $0x128] sm:$0xff] }
  0x78   : > { %v1930_v40 = vadd.f32 %v1827_v61, %v1686_v57  ;;  %v506_v4 = vrot.slane %v389_v59, 1  ;;  %v507_v5 = vrot.slane %v390_v63, 1  ;;  %v634_v8 = vmul.f32 %v2675_v20, %v2827_v55  ;;  %v3125_v61 = vld [vmem:[%s2648_s17 + $0x130] sm:$0x3] }
  0x79   : > { %v635_v9 = vmul.f32 %v2675_v20, %v2837_v0  ;;  %v636_v10 = vmul.f32 %v2675_v20, %v2841_v6  ;;  %v509_v13 = vrot.slane %v391_v3, 1  ;;  %v869_v47 = vmul.f32 %v2683_v22, %v2971_v16 }
  0x7a   : > { %v1959_v11 = vpack.c.bf16 %v1930_v40, %v1929_v33  ;;  %v870_v17 = vmul.f32 %v2683_v22, %v2976_v27  ;;  %v508_v25 = vsel %vm455_vm0, %v506_v4, %v507_v5  ;;  %v751_v26 = vrot.slane %v634_v8, 2 }
  0x7b   : > { %v752_v30 = vrot.slane %v635_v9, 2  ;;  %v754_v55 = vrot.slane %v636_v10, 2  ;;  %v510_v0 = vsel %vm455_vm0, %v507_v5, %v509_v13  ;;  %v588_v31 = vadd.f32 %v508_v25, %v343_v58 }
  0x7c   : > { %2380 = vmatprep.mubr.bf16.mxu0 %v1959_v11  ;;  %v947_v6 = vmul.f32 %v2686_v23, %v2971_v16  ;;  %v948_v35 = vmul.f32 %v2686_v23, %v2976_v27  ;;  %v589_v36 = vadd.f32 %v510_v0, %v344_v62  ;;  %v949_v41 = vmul.f32 %v2686_v23, %v2986_v43 }
  0x7d   : > { %v753_v39 = vsel %vm700_vm1, %v751_v26, %v752_v30  ;;  %v755_v37 = vsel %vm700_vm1, %v752_v30, %v754_v55  ;;  %v1191_v46 = vmul.f32 %v2689_v24, %v2971_v16  ;;  %v1192_v12 = vmul.f32 %v2689_v24, %v2976_v27 }
  0x7e   : > { %v833_v42 = vadd.f32 %v753_v39, %v588_v31  ;;  %v1063_v45 = vrot.slane %v947_v6, 1  ;;  %v1064_v44 = vrot.slane %v948_v35, 1  ;;  %v834_v14 = vadd.f32 %v755_v37, %v589_v36 }
  0x7f   : > { %v1066_v49 = vrot.slane %v949_v41, 1  ;;  %v1193_v50 = vmul.f32 %v2689_v24, %v2986_v43  ;;  %v1307_v52 = vrot.slane %v1191_v46, 2  ;;  %v1425_v54 = vmul.f32 %v2699_v32, %v3111_v1 }
  0x80   : > { %v901_v34 = vadd.f32 %v869_v47, %v833_v42  ;;  %v1065_v51 = vsel %vm455_vm0, %v1063_v45, %v1064_v44  ;;  %v902_v57 = vadd.f32 %v870_v17, %v834_v14  ;;  %v1308_v59 = vrot.slane %v1192_v12, 2 }
  0x81   : > { %v1067_v58 = vsel %vm455_vm0, %v1064_v44, %v1066_v49  ;;  %v1310_v60 = vrot.slane %v1193_v50, 2  ;;  %v1426_v63 = vmul.f32 %v2699_v32, %v3121_v56  ;;  %v1503_v33 = vmul.f32 %v2763_v28, %v3111_v1 }
  0x82   : > { %v1145_v62 = vadd.f32 %v1065_v51, %v901_v34  ;;  %v1504_v40 = vmul.f32 %v2763_v28, %v3121_v56  ;;  %v1146_v3 = vadd.f32 %v1067_v58, %v902_v57  ;;  %v1309_v4 = vsel %vm700_vm1, %v1307_v52, %v1308_v59 }
  0x83   : > { %v1311_v5 = vsel %vm700_vm1, %v1308_v59, %v1310_v60  ;;  %v1505_v8 = vmul.f32 %v2763_v28, %v3125_v61  ;;  %v1619_v10 = vrot.slane %v1503_v33, 1  ;;  %v1747_v13 = vmul.f32 %v2751_v7, %v3111_v1 }
  0x84   : > { %v1389_v9 = vadd.f32 %v1309_v4, %v1145_v62  ;;  %v1620_v11 = vrot.slane %v1504_v40, 1  ;;  %v1390_v47 = vadd.f32 %v1311_v5, %v1146_v3  ;;  %v1748_v25 = vmul.f32 %v2751_v7, %v3121_v56 }
  0x85   : > { %v1622_v17 = vrot.slane %v1505_v8, 1  ;;  %v1749_v26 = vmul.f32 %v2751_v7, %v3125_v61  ;;  %v1863_v0 = vrot.slane %v1747_v13, 2  ;;  %v291_v31 = vmul.f32 %v2669_v18, %v2898_v29 }
  0x86   : > { %v1457_v30 = vadd.f32 %v1425_v54, %v1389_v9  ;;  %v1621_v55 = vsel %vm455_vm0, %v1619_v10, %v1620_v11  ;;  %v1458_v6 = vadd.f32 %v1426_v63, %v1390_v47  ;;  %v1864_v36 = vrot.slane %v1748_v25, 2  ;;  %v3182_v25 = vld [vmem:[%s2648_s17 + $0x78] sm:$0xff] }
  0x87   : > { %v1623_v35 = vsel %vm455_vm0, %v1620_v11, %v1622_v17  ;;  %v1866_v39 = vrot.slane %v1749_v26, 2  ;;  %v292_v41 = vmul.f32 %v2669_v18, %v2908_v48  ;;  %v329_v42 = vadd.f32 %v2680_v21, %v291_v31 }
  0x88   : > { %v1701_v37 = vadd.f32 %v1621_v55, %v1457_v30  ;;  %v368_v45 = vmul.f32 %v2672_v19, %v2898_v29  ;;  %v1702_v44 = vadd.f32 %v1623_v35, %v1458_v6  ;;  %v1865_v46 = vsel %vm700_vm1, %v1863_v0, %v1864_v36 }
  0x89   : > { %v1867_v14 = vsel %vm700_vm1, %v1864_v36, %v1866_v39  ;;  %v369_v49 = vmul.f32 %v2672_v19, %v2908_v48  ;;  %v330_v50 = vadd.f32 %v2680_v21, %v292_v41  ;;  %v370_v34 = vmul.f32 %v2672_v19, %v2912_v53  ;;  %v3191_v39 = vld [vmem:[%s2648_s17 + $0x80] sm:$0xff] }
  0x8a   : > { %v1945_v12 = vadd.f32 %v1865_v46, %v1701_v37  ;;  %v471_v51 = vrot.slane %v368_v45, 1  ;;  %v1946_v52 = vadd.f32 %v1867_v14, %v1702_v44  ;;  %v613_v57 = vmul.f32 %v2675_v20, %v2898_v29  ;;  %v3196_v44 = vld [vmem:[%s2648_s17 + $0x88] sm:$0x3] }
  0x8b   : > { %v472_v54 = vrot.slane %v369_v49, 1  ;;  %v614_v58 = vmul.f32 %v2675_v20, %v2908_v48  ;;  %v474_v59 = vrot.slane %v370_v34, 1  ;;  %v615_v60 = vmul.f32 %v2675_v20, %v2912_v53 }
  0x8c   : > { %v855_v62 = vmul.f32 %v2683_v22, %v3040_v15  ;;  %v856_v21 = vmul.f32 %v2683_v22, %v3047_v2  ;;  %v1967_v63 = vpack.c.bf16 %v1946_v52, %v1945_v12  ;;  %v716_v40 = vrot.slane %v613_v57, 2 }
  0x8d   : > { %v473_v33 = vsel %vm455_vm0, %v471_v51, %v472_v54  ;;  %v717_v3 = vrot.slane %v614_v58, 2  ;;  %v475_v29 = vsel %vm455_vm0, %v472_v54, %v474_v59  ;;  %v719_v48 = vrot.slane %v615_v60, 2 }
  0x8e   : > { %v574_v4 = vadd.f32 %v473_v33, %v329_v42  ;;  %v926_v5 = vmul.f32 %v2686_v23, %v3040_v15  ;;  %2396 = vmatprep.mubr.bf16.mxu1 %v1967_v63  ;;  %v575_v53 = vadd.f32 %v475_v29, %v330_v50  ;;  %v927_v9 = vmul.f32 %v2686_v23, %v3047_v2 }
  0x8f   : > { %v718_v8 = vsel %vm700_vm1, %v716_v40, %v717_v3  ;;  %v928_v10 = vmul.f32 %v2686_v23, %v3056_v38  ;;  %v720_v11 = vsel %vm700_vm1, %v717_v3, %v719_v48  ;;  %v1170_v17 = vmul.f32 %v2689_v24, %v3040_v15 }
  0x90   : > { %v819_v13 = vadd.f32 %v718_v8, %v574_v4  ;;  %v1028_v47 = vrot.slane %v926_v5, 1  ;;  %v820_v26 = vadd.f32 %v720_v11, %v575_v53  ;;  %v1029_v30 = vrot.slane %v927_v9, 1  ;;  %v3223_v11 = vld [vmem:[%s3989_s2] ss:$0 sm:$0xff] }
  0x91   : > { %v1031_v55 = vrot.slane %v928_v10, 1  ;;  %v1171_v0 = vmul.f32 %v2689_v24, %v3047_v2  ;;  %v1172_v6 = vmul.f32 %v2689_v24, %v3056_v38  ;;  %v1272_v35 = vrot.slane %v1170_v17, 2 }
  0x92   : > { %v887_v31 = vadd.f32 %v855_v62, %v819_v13  ;;  %v1411_v36 = vmul.f32 %v2699_v32, %v3182_v25  ;;  %v888_v37 = vadd.f32 %v856_v21, %v820_v26  ;;  %v1030_v41 = vsel %vm455_vm0, %v1028_v47, %v1029_v30 }
  0x93   : > { %v1032_v42 = vsel %vm455_vm0, %v1029_v30, %v1031_v55  ;;  %v1273_v45 = vrot.slane %v1171_v0, 2  ;;  %v1275_v14 = vrot.slane %v1172_v6, 2  ;;  %v1412_v49 = vmul.f32 %v2699_v32, %v3191_v39 }
  0x94   : > { %v1131_v46 = vadd.f32 %v1030_v41, %v887_v31  ;;  %v1482_v12 = vmul.f32 %v2763_v28, %v3182_v25  ;;  %v1132_v50 = vadd.f32 %v1032_v42, %v888_v37  ;;  %v1483_v51 = vmul.f32 %v2763_v28, %v3191_v39 }
  0x95   : > { %v1274_v34 = vsel %vm700_vm1, %v1272_v35, %v1273_v45  ;;  %v1484_v52 = vmul.f32 %v2763_v28, %v3196_v44  ;;  %v1276_v54 = vsel %vm700_vm1, %v1273_v45, %v1275_v14  ;;  %v1726_v59 = vmul.f32 %v2751_v7, %v3182_v25 }
  0x96   : > { %v1375_v57 = vadd.f32 %v1274_v34, %v1131_v46  ;;  %v1584_v58 = vrot.slane %v1482_v12, 1  ;;  %v1376_v60 = vadd.f32 %v1276_v54, %v1132_v50  ;;  %v1585_v62 = vrot.slane %v1483_v51, 1 }
  0x97   : > { %v1587_v21 = vrot.slane %v1484_v52, 1  ;;  %v1727_v63 = vmul.f32 %v2751_v7, %v3191_v39  ;;  %v1728_v40 = vmul.f32 %v2751_v7, %v3196_v44  ;;  %v1828_v3 = vrot.slane %v1726_v59, 2 }
  0x98   : > { %v1443_v33 = vadd.f32 %v1411_v36, %v1375_v57  ;;  %v307_v29 = vmul.f32 %v2669_v18, %v2971_v16  ;;  %v1444_v4 = vadd.f32 %v1412_v49, %v1376_v60  ;;  %v1586_v48 = vsel %vm455_vm0, %v1584_v58, %v1585_v62 }
  0x99   : > { %v1588_v5 = vsel %vm455_vm0, %v1585_v62, %v1587_v21  ;;  %v1829_v53 = vrot.slane %v1727_v63, 2  ;;  %v1831_v9 = vrot.slane %v1728_v40, 2  ;;  %v308_v10 = vmul.f32 %v2669_v18, %v2976_v27 }
  0x9a   : > { %v1687_v8 = vadd.f32 %v1586_v48, %v1443_v33  ;;  %v345_v7 = vadd.f32 %v3223_v11, %v307_v29  ;;  %v1688_v13 = vadd.f32 %v1588_v5, %v1444_v4  ;;  %v392_v17 = vmul.f32 %v2672_v19, %v2971_v16 }
  0x9b   : > { %v1830_v47 = vsel %vm700_vm1, %v1828_v3, %v1829_v53  ;;  %v393_v26 = vmul.f32 %v2672_v19, %v2976_v27  ;;  %v1832_v30 = vsel %vm700_vm1, %v1829_v53, %v1831_v9  ;;  %v346_v0 = vadd.f32 %v3223_v11, %v308_v10  ;;  %v3260_v3 = vld [vmem:[%s2648_s17 + $0x138] sm:$0xff]  ;;  %v3265_v53 = vld [vmem:[%s2648_s17 + $0x140] sm:$0xff] }
  0x9c   : > { %v1931_v55 = vadd.f32 %v1830_v47, %v1687_v8  ;;  %v394_v31 = vmul.f32 %v2672_v19, %v2986_v43  ;;  %v1932_v6 = vadd.f32 %v1832_v30, %v1688_v13  ;;  %v511_v35 = vrot.slane %v392_v17, 1  ;;  %v3275_v30 = vld [vmem:[%s2648_s17 + $0x148] sm:$0x3] }
  0x9d   : > { %v512_v36 = vrot.slane %v393_v26, 1  ;;  %v637_v37 = vmul.f32 %v2675_v20, %v2971_v16  ;;  %v638_v42 = vmul.f32 %v2675_v20, %v2976_v27  ;;  %v639_v45 = vmul.f32 %v2675_v20, %v2986_v43 }
  0x9e   : > { %v514_v41 = vrot.slane %v394_v31, 1  ;;  %v871_v46 = vmul.f32 %v2683_v22, %v3111_v1  ;;  %v1960_v14 = vpack.c.bf16 %v1932_v6, %v1931_v55  ;;  %v872_v50 = vmul.f32 %v2683_v22, %v3121_v56 }
  0x9f   : > { %v513_v49 = vsel %vm455_vm0, %v511_v35, %v512_v36  ;;  %v756_v12 = vrot.slane %v637_v37, 2  ;;  %v757_v51 = vrot.slane %v638_v42, 2  ;;  %v759_v52 = vrot.slane %v639_v45, 2  ;;  %v3287_v37 = vld [vmem:[%s3988_s1 + $0x8] ss:$0 sm:$0xff] }
  0xa0   : > { %v515_v34 = vsel %vm455_vm0, %v512_v36, %v514_v41  ;;  %v590_v16 = vadd.f32 %v513_v49, %v345_v7  ;;  %2381 = vmatmul.mubr.bf16.gmra.mrb[4].mxu0 %v1960_v14  ;;  %v950_v43 = vmul.f32 %v2686_v23, %v3111_v1  ;;  %v951_v54 = vmul.f32 %v2686_v23, %v3121_v56 }
  0xa1   : > { %v591_v27 = vadd.f32 %v515_v34, %v346_v0  ;;  %v952_v57 = vmul.f32 %v2686_v23, %v3125_v61  ;;  %v758_v58 = vsel %vm700_vm1, %v756_v12, %v757_v51  ;;  %v760_v59 = vsel %vm700_vm1, %v757_v51, %v759_v52 }
  0xa2   : > { %v1194_v60 = vmul.f32 %v2689_v24, %v3111_v1  ;;  %v1195_v62 = vmul.f32 %v2689_v24, %v3121_v56  ;;  %v835_v21 = vadd.f32 %v758_v58, %v590_v16  ;;  %v1068_v33 = vrot.slane %v950_v43, 1 }
  0xa3   : > { %v836_v63 = vadd.f32 %v760_v59, %v591_v27  ;;  %v1069_v40 = vrot.slane %v951_v54, 1  ;;  %v1071_v29 = vrot.slane %v952_v57, 1  ;;  %v1196_v4 = vmul.f32 %v2689_v24, %v3125_v61 }
  0xa4   : > { %v1312_v48 = vrot.slane %v1194_v60, 2  ;;  %v1313_v5 = vrot.slane %v1195_v62, 2  ;;  %v903_v8 = vadd.f32 %v871_v46, %v835_v21  ;;  %v1427_v7 = vmul.f32 %v2699_v32, %v3260_v3 }
  0xa5   : > { %v904_v9 = vadd.f32 %v872_v50, %v836_v63  ;;  %v1070_v10 = vsel %vm455_vm0, %v1068_v33, %v1069_v40  ;;  %v1072_v13 = vsel %vm455_vm0, %v1069_v40, %v1071_v29  ;;  %v1315_v17 = vrot.slane %v1196_v4, 2 }
  0xa6   : > { %v1314_v47 = vsel %vm700_vm1, %v1312_v48, %v1313_v5  ;;  %v1428_v26 = vmul.f32 %v2699_v32, %v3265_v53  ;;  %v1147_v55 = vadd.f32 %v1070_v10, %v903_v8  ;;  %v1506_v31 = vmul.f32 %v2763_v28, %v3260_v3 }
  0xa7   : > { %v1148_v0 = vadd.f32 %v1072_v13, %v904_v9  ;;  %v1507_v6 = vmul.f32 %v2763_v28, %v3265_v53  ;;  %v1316_v35 = vsel %vm700_vm1, %v1313_v5, %v1315_v17  ;;  %v1508_v36 = vmul.f32 %v2763_v28, %v3275_v30 }
  0xa8   : > { %v1750_v41 = vmul.f32 %v3287_v37, %v3260_v3  ;;  %v1751_v42 = vmul.f32 %v3287_v37, %v3265_v53  ;;  %v1391_v45 = vadd.f32 %v1314_v47, %v1147_v55  ;;  %v1624_v14 = vrot.slane %v1506_v31, 1 }
  0xa9   : > { %v1392_v46 = vadd.f32 %v1316_v35, %v1148_v0  ;;  %v1625_v49 = vrot.slane %v1507_v6, 1  ;;  %v1627_v12 = vrot.slane %v1508_v36, 1  ;;  %v1752_v50 = vmul.f32 %v3287_v37, %v3275_v30 }
  0xaa   : > { %v1868_v34 = vrot.slane %v1750_v41, 2  ;;  %v1869_v16 = vrot.slane %v1751_v42, 2  ;;  %v1459_v51 = vadd.f32 %v1427_v7, %v1391_v45  ;;  %v293_v43 = vmul.f32 %v2669_v18, %v3040_v15 }
  0xab   : > { %v1460_v52 = vadd.f32 %v1428_v26, %v1392_v46  ;;  %v1626_v27 = vsel %vm455_vm0, %v1624_v14, %v1625_v49  ;;  %v1628_v54 = vsel %vm455_vm0, %v1625_v49, %v1627_v12  ;;  %v1871_v58 = vrot.slane %v1752_v50, 2 }
  0xac   : > { %v1870_v57 = vsel %vm700_vm1, %v1868_v34, %v1869_v16  ;;  %v294_v59 = vmul.f32 %v2669_v18, %v3047_v2  ;;  %v1703_v60 = vadd.f32 %v1626_v27, %v1459_v51  ;;  %v331_v21 = vadd.f32 %v3223_v11, %v293_v43 }
  0xad   : > { %v1704_v62 = vadd.f32 %v1628_v54, %v1460_v52  ;;  %v371_v63 = vmul.f32 %v2672_v19, %v3040_v15  ;;  %v1872_v33 = vsel %vm700_vm1, %v1869_v16, %v1871_v58  ;;  %v372_v29 = vmul.f32 %v2672_v19, %v3047_v2  ;;  %v3334_v16 = vld [vmem:[%s2648_s17 + $0x90] sm:$0xff]  ;;  %v3341_v54 = vld [vmem:[%s2648_s17 + $0x98] sm:$0xff] }
  0xae   : > { %v332_v40 = vadd.f32 %v3223_v11, %v294_v59  ;;  %v373_v4 = vmul.f32 %v2672_v19, %v3056_v38  ;;  %v1947_v48 = vadd.f32 %v1870_v57, %v1703_v60  ;;  %v616_v9 = vmul.f32 %v2675_v20, %v3040_v15 }
  0xaf   : > { %v1948_v5 = vadd.f32 %v1872_v33, %v1704_v62  ;;  %v476_v8 = vrot.slane %v371_v63, 1  ;;  %v477_v10 = vrot.slane %v372_v29, 1  ;;  %v617_v13 = vmul.f32 %v2675_v20, %v3047_v2 }
  0xb0   : > { %v479_v7 = vrot.slane %v373_v4, 1  ;;  %v618_v47 = vmul.f32 %v2675_v20, %v3056_v38  ;;  %v721_v26 = vrot.slane %v616_v9, 2  ;;  %v857_v55 = vmul.f32 %v2683_v22, %v3182_v25 }
  0xb1   : > { %v1968_v17 = vpack.c.bf16 %v1948_v5, %v1947_v48  ;;  %v858_v0 = vmul.f32 %v2683_v22, %v3191_v39  ;;  %v478_v31 = vsel %vm455_vm0, %v476_v8, %v477_v10  ;;  %v722_v6 = vrot.slane %v617_v13, 2 }
  0xb2   : > { %v480_v15 = vsel %vm455_vm0, %v477_v10, %v479_v7  ;;  %v724_v35 = vrot.slane %v618_v47, 2  ;;  %v576_v2 = vadd.f32 %v478_v31, %v331_v21  ;;  %v929_v38 = vmul.f32 %v2686_v23, %v3182_v25 }
  0xb3   : > { %2397 = vmatmul.mubr.bf16.gmra.mrb[4].mxu1 %v1968_v17  ;;  %v577_v36 = vadd.f32 %v480_v15, %v332_v40  ;;  %v930_v41 = vmul.f32 %v2686_v23, %v3191_v39  ;;  %v723_v42 = vsel %vm700_vm1, %v721_v26, %v722_v6  ;;  %v931_v46 = vmul.f32 %v2686_v23, %v3196_v44  ;;  %v3350_v40 = vld [vmem:[%s2648_s17 + $0xa0] sm:$0x3] }
  0xb4   : > { %v725_v45 = vsel %vm700_vm1, %v722_v6, %v724_v35  ;;  %v1173_v14 = vmul.f32 %v2689_v24, %v3182_v25  ;;  %v821_v49 = vadd.f32 %v723_v42, %v576_v2  ;;  %v1033_v50 = vrot.slane %v929_v38, 1 }
  0xb5   : > { %v822_v12 = vadd.f32 %v725_v45, %v577_v36  ;;  %v1034_v34 = vrot.slane %v930_v41, 1  ;;  %v1036_v51 = vrot.slane %v931_v46, 1  ;;  %v1174_v52 = vmul.f32 %v2689_v24, %v3191_v39 }
  0xb6   : > { %v1175_v27 = vmul.f32 %v2689_v24, %v3196_v44  ;;  %v1277_v43 = vrot.slane %v1173_v14, 2  ;;  %v889_v57 = vadd.f32 %v857_v55, %v821_v49  ;;  %v1413_v60 = vmul.f32 %v2699_v32, %v3334_v16 }
  0xb7   : > { %v890_v58 = vadd.f32 %v858_v0, %v822_v12  ;;  %v1035_v59 = vsel %vm455_vm0, %v1033_v50, %v1034_v34  ;;  %v1037_v62 = vsel %vm455_vm0, %v1034_v34, %v1036_v51  ;;  %v1278_v21 = vrot.slane %v1174_v52, 2 }
  0xb8   : > { %v1280_v63 = vrot.slane %v1175_v27, 2  ;;  %v1414_v33 = vmul.f32 %v2699_v32, %v3341_v54  ;;  %v1133_v29 = vadd.f32 %v1035_v59, %v889_v57  ;;  %v1485_v48 = vmul.f32 %v2763_v28, %v3334_v16 }
  0xb9   : > { %v1134_v4 = vadd.f32 %v1037_v62, %v890_v58  ;;  %v1486_v5 = vmul.f32 %v2763_v28, %v3341_v54  ;;  %v1279_v8 = vsel %vm700_vm1, %v1277_v43, %v1278_v21  ;;  %v1487_v10 = vmul.f32 %v2763_v28, %v3350_v40 }
  0xba   : > { %v1281_v9 = vsel %vm700_vm1, %v1278_v21, %v1280_v63  ;;  %v1729_v7 = vmul.f32 %v3287_v37, %v3334_v16  ;;  %v1377_v13 = vadd.f32 %v1279_v8, %v1133_v29  ;;  %v1589_v17 = vrot.slane %v1485_v48, 1 }
  0xbb   : > { %v1378_v47 = vadd.f32 %v1281_v9, %v1134_v4  ;;  %v1590_v26 = vrot.slane %v1486_v5, 1  ;;  %v1592_v55 = vrot.slane %v1487_v10, 1  ;;  %v1730_v0 = vmul.f32 %v3287_v37, %v3341_v54 }
  0xbc   : > { %v1731_v31 = vmul.f32 %v3287_v37, %v3350_v40  ;;  %v1833_v15 = vrot.slane %v1729_v7, 2  ;;  %v1445_v6 = vadd.f32 %v1413_v60, %v1377_v13  ;;  %v309_v36 = vmul.f32 %v2669_v18, %v3111_v1 }
  0xbd   : > { %v1446_v35 = vadd.f32 %v1414_v33, %v1378_v47  ;;  %v1591_v2 = vsel %vm455_vm0, %v1589_v17, %v1590_v26  ;;  %v1593_v38 = vsel %vm455_vm0, %v1590_v26, %v1592_v55  ;;  %v1834_v41 = vrot.slane %v1730_v0, 2 }
  0xbe   : > { %v1836_v42 = vrot.slane %v1731_v31, 2  ;;  %v310_v45 = vmul.f32 %v2669_v18, %v3121_v56  ;;  %v1689_v46 = vadd.f32 %v1591_v2, %v1445_v6  ;;  %v347_v49 = vadd.f32 %v3223_v11, %v309_v36 }
  0xbf   : > { %v1690_v14 = vadd.f32 %v1593_v38, %v1446_v35  ;;  %v395_v12 = vmul.f32 %v2672_v19, %v3111_v1  ;;  %v1835_v50 = vsel %vm700_vm1, %v1833_v15, %v1834_v41  ;;  %v396_v52 = vmul.f32 %v2672_v19, %v3121_v56  ;;  %v3405_v15 = vld [vmem:[%s2648_s17 + $0x150] sm:$0xff] }
  0xc0   : > { %v1837_v34 = vsel %vm700_vm1, %v1834_v41, %v1836_v42  ;;  %v348_v51 = vadd.f32 %v3223_v11, %v310_v45  ;;  %v1933_v27 = vadd.f32 %v1835_v50, %v1689_v46  ;;  %v397_v57 = vmul.f32 %v2672_v19, %v3125_v61  ;;  %v3415_v46 = vld [vmem:[%s2648_s17 + $0x158] sm:$0xff] }
  0xc1   : > { %v1934_v43 = vadd.f32 %v1837_v34, %v1690_v14  ;;  %v516_v58 = vrot.slane %v395_v12, 1  ;;  %v517_v59 = vrot.slane %v396_v52, 1  ;;  %v640_v60 = vmul.f32 %v2675_v20, %v3111_v1  ;;  %v3419_v34 = vld [vmem:[%s2648_s17 + $0x160] sm:$0x3] }
  0xc2   : > { %v641_v62 = vmul.f32 %v2675_v20, %v3121_v56  ;;  %v642_v21 = vmul.f32 %v2675_v20, %v3125_v61  ;;  %v519_v33 = vrot.slane %v397_v57, 1  ;;  %v873_v29 = vmul.f32 %v2683_v22, %v3260_v3 }
  0xc3   : > { %v1961_v63 = vpack.c.bf16 %v1934_v43, %v1933_v27  ;;  %v874_v4 = vmul.f32 %v2683_v22, %v3265_v53  ;;  %v518_v48 = vsel %vm455_vm0, %v516_v58, %v517_v59  ;;  %v761_v5 = vrot.slane %v640_v60, 2 }
  0xc4   : > { %v762_v8 = vrot.slane %v641_v62, 2  ;;  %v764_v1 = vrot.slane %v642_v21, 2  ;;  %v520_v56 = vsel %vm455_vm0, %v517_v59, %v519_v33  ;;  %v592_v9 = vadd.f32 %v518_v48, %v347_v49 }
  0xc5   : > { %2384 = vmatprep.mubr.bf16.mxu0 %v1961_v63  ;;  %v953_v61 = vmul.f32 %v2686_v23, %v3260_v3  ;;  %v954_v10 = vmul.f32 %v2686_v23, %v3265_v53  ;;  %v593_v7 = vadd.f32 %v520_v56, %v348_v51  ;;  %v955_v17 = vmul.f32 %v2686_v23, %v3275_v30 }
  0xc6   : > { %v763_v13 = vsel %vm700_vm1, %v761_v5, %v762_v8  ;;  %v765_v47 = vsel %vm700_vm1, %v762_v8, %v764_v1  ;;  %v1197_v31 = vmul.f32 %v2689_v24, %v3260_v3  ;;  %v1198_v2 = vmul.f32 %v2689_v24, %v3265_v53 }
  0xc7   : > { %v837_v26 = vadd.f32 %v763_v13, %v592_v9  ;;  %v1073_v55 = vrot.slane %v953_v61, 1  ;;  %v1074_v0 = vrot.slane %v954_v10, 1  ;;  %v838_v6 = vadd.f32 %v765_v47, %v593_v7 }
  0xc8   : > { %v1076_v35 = vrot.slane %v955_v17, 1  ;;  %v1199_v36 = vmul.f32 %v2689_v24, %v3275_v30  ;;  %v1317_v42 = vrot.slane %v1197_v31, 2  ;;  %v1429_v45 = vmul.f32 %v2699_v32, %v3405_v15 }
  0xc9   : > { %v905_v38 = vadd.f32 %v873_v29, %v837_v26  ;;  %v1075_v41 = vsel %vm455_vm0, %v1073_v55, %v1074_v0  ;;  %v906_v14 = vadd.f32 %v874_v4, %v838_v6  ;;  %v1318_v12 = vrot.slane %v1198_v2, 2 }
  0xca   : > { %v1077_v49 = vsel %vm455_vm0, %v1074_v0, %v1076_v35  ;;  %v1320_v50 = vrot.slane %v1199_v36, 2  ;;  %v1430_v52 = vmul.f32 %v2699_v32, %v3415_v46  ;;  %v1509_v27 = vmul.f32 %v2763_v28, %v3405_v15 }
  0xcb   : > { %v1149_v51 = vadd.f32 %v1075_v41, %v905_v38  ;;  %v1510_v43 = vmul.f32 %v2763_v28, %v3415_v46  ;;  %v1150_v57 = vadd.f32 %v1077_v49, %v906_v14  ;;  %v1319_v58 = vsel %vm700_vm1, %v1317_v42, %v1318_v12 }
  0xcc   : > { %v1321_v59 = vsel %vm700_vm1, %v1318_v12, %v1320_v50  ;;  %v1511_v60 = vmul.f32 %v2763_v28, %v3419_v34  ;;  %v1629_v21 = vrot.slane %v1509_v27, 1  ;;  %v1753_v33 = vmul.f32 %v3287_v37, %v3405_v15 }
  0xcd   : > { %v1393_v62 = vadd.f32 %v1319_v58, %v1149_v51  ;;  %v1630_v63 = vrot.slane %v1510_v43, 1  ;;  %v1394_v29 = vadd.f32 %v1321_v59, %v1150_v57  ;;  %v1754_v48 = vmul.f32 %v3287_v37, %v3415_v46 }
  0xce   : > { %v1632_v4 = vrot.slane %v1511_v60, 1  ;;  %v1755_v5 = vmul.f32 %v3287_v37, %v3419_v34  ;;  %v1873_v56 = vrot.slane %v1753_v33, 2  ;;  %v295_v9 = vmul.f32 %v2669_v18, %v3182_v25 }
  0xcf   : > { %v1461_v8 = vadd.f32 %v1429_v45, %v1393_v62  ;;  %v1631_v1 = vsel %vm455_vm0, %v1629_v21, %v1630_v63  ;;  %v1462_v61 = vadd.f32 %v1430_v52, %v1394_v29  ;;  %v1874_v7 = vrot.slane %v1754_v48, 2 }
  0xd0   : > { %v1633_v10 = vsel %vm455_vm0, %v1630_v63, %v1632_v4  ;;  %v1876_v13 = vrot.slane %v1755_v5, 2  ;;  %v296_v17 = vmul.f32 %v2669_v18, %v3191_v39  ;;  %v333_v26 = vadd.f32 %v3223_v11, %v295_v9  ;;  %v3476_v5 = vld [vmem:[%s2648_s17 + $0xa8] sm:$0xff] }
  0xd1   : > { %v1705_v47 = vadd.f32 %v1631_v1, %v1461_v8  ;;  %v374_v55 = vmul.f32 %v2672_v19, %v3182_v25  ;;  %v1706_v0 = vadd.f32 %v1633_v10, %v1462_v61  ;;  %v1875_v31 = vsel %vm700_vm1, %v1873_v56, %v1874_v7 }
  0xd2   : > { %v1877_v6 = vsel %vm700_vm1, %v1874_v7, %v1876_v13  ;;  %v375_v35 = vmul.f32 %v2672_v19, %v3191_v39  ;;  %v334_v36 = vadd.f32 %v3223_v11, %v296_v17  ;;  %v376_v38 = vmul.f32 %v2672_v19, %v3196_v44 }
  0xd3   : > { %v1949_v2 = vadd.f32 %v1875_v31, %v1705_v47  ;;  %v481_v41 = vrot.slane %v374_v55, 1  ;;  %v1950_v42 = vadd.f32 %v1877_v6, %v1706_v0  ;;  %v619_v14 = vmul.f32 %v2675_v20, %v3182_v25  ;;  %v3485_v47 = vld [vmem:[%s2648_s17 + $0xb0] sm:$0xff]  ;;  %v3490_v31 = vld [vmem:[%s2648_s17 + $0xb8] sm:$0x3] }
  0xd4   : > { %v482_v45 = vrot.slane %v375_v35, 1  ;;  %v620_v49 = vmul.f32 %v2675_v20, %v3191_v39  ;;  %v484_v12 = vrot.slane %v376_v38, 1  ;;  %v621_v50 = vmul.f32 %v2675_v20, %v3196_v44 }
  0xd5   : > { %v859_v51 = vmul.f32 %v2683_v22, %v3334_v16  ;;  %v860_v52 = vmul.f32 %v2683_v22, %v3341_v54  ;;  %v1969_v27 = vpack.c.bf16 %v1950_v42, %v1949_v2  ;;  %v726_v57 = vrot.slane %v619_v14, 2 }
  0xd6   : > { %v483_v43 = vsel %vm455_vm0, %v481_v41, %v482_v45  ;;  %v727_v58 = vrot.slane %v620_v49, 2  ;;  %v485_v25 = vsel %vm455_vm0, %v482_v45, %v484_v12  ;;  %v729_v39 = vrot.slane %v621_v50, 2 }
  0xd7   : > { %v578_v59 = vadd.f32 %v483_v43, %v333_v26  ;;  %v932_v60 = vmul.f32 %v2686_v23, %v3334_v16  ;;  %2400 = vmatprep.mubr.bf16.mxu1 %v1969_v27  ;;  %v579_v44 = vadd.f32 %v485_v25, %v334_v36  ;;  %v933_v21 = vmul.f32 %v2686_v23, %v3341_v54 }
  0xd8   : > { %v728_v62 = vsel %vm700_vm1, %v726_v57, %v727_v58  ;;  %v934_v63 = vmul.f32 %v2686_v23, %v3350_v40  ;;  %v730_v33 = vsel %vm700_vm1, %v727_v58, %v729_v39  ;;  %v1176_v48 = vmul.f32 %v2689_v24, %v3334_v16 }
  0xd9   : > { %v823_v29 = vadd.f32 %v728_v62, %v578_v59  ;;  %v1038_v4 = vrot.slane %v932_v60, 1  ;;  %v824_v8 = vadd.f32 %v730_v33, %v579_v44  ;;  %v1039_v1 = vrot.slane %v933_v21, 1 }
  0xda   : > { %v1041_v56 = vrot.slane %v934_v63, 1  ;;  %v1177_v9 = vmul.f32 %v2689_v24, %v3341_v54  ;;  %v1178_v10 = vmul.f32 %v2689_v24, %v3350_v40  ;;  %v1282_v7 = vrot.slane %v1176_v48, 2 }
  0xdb   : > { %v891_v61 = vadd.f32 %v859_v51, %v823_v29  ;;  %v1415_v13 = vmul.f32 %v2699_v32, %v3476_v5  ;;  %v892_v17 = vadd.f32 %v860_v52, %v824_v8  ;;  %v1040_v26 = vsel %vm455_vm0, %v1038_v4, %v1039_v1 }
  0xdc   : > { %v1042_v55 = vsel %vm455_vm0, %v1039_v1, %v1041_v56  ;;  %v1283_v0 = vrot.slane %v1177_v9, 2  ;;  %v1285_v35 = vrot.slane %v1178_v10, 2  ;;  %v1416_v2 = vmul.f32 %v2699_v32, %v3485_v47 }
  0xdd   : > { %v1135_v6 = vadd.f32 %v1040_v26, %v891_v61  ;;  %v1488_v36 = vmul.f32 %v2763_v28, %v3476_v5  ;;  %v1136_v38 = vadd.f32 %v1042_v55, %v892_v17  ;;  %v1489_v42 = vmul.f32 %v2763_v28, %v3485_v47 }
  0xde   : > { %v1284_v41 = vsel %vm700_vm1, %v1282_v7, %v1283_v0  ;;  %v1490_v45 = vmul.f32 %v2763_v28, %v3490_v31  ;;  %v1286_v14 = vsel %vm700_vm1, %v1283_v0, %v1285_v35  ;;  %v1732_v50 = vmul.f32 %v3287_v37, %v3476_v5 }
  0xdf   : > { %v1379_v49 = vadd.f32 %v1284_v41, %v1135_v6  ;;  %v1594_v12 = vrot.slane %v1488_v36, 1  ;;  %v1380_v51 = vadd.f32 %v1286_v14, %v1136_v38  ;;  %v1595_v52 = vrot.slane %v1489_v42, 1 }
  0xe0   : > { %v1597_v27 = vrot.slane %v1490_v45, 1  ;;  %v1733_v43 = vmul.f32 %v3287_v37, %v3485_v47  ;;  %v1734_v58 = vmul.f32 %v3287_v37, %v3490_v31  ;;  %v1838_v25 = vrot.slane %v1732_v50, 2 }
  0xe1   : > { %v1447_v57 = vadd.f32 %v1415_v13, %v1379_v49  ;;  %v311_v59 = vmul.f32 %v2669_v18, %v3260_v3  ;;  %v1448_v39 = vadd.f32 %v1416_v2, %v1380_v51  ;;  %v1596_v60 = vsel %vm455_vm0, %v1594_v12, %v1595_v52 }
  0xe2   : > { %v1598_v44 = vsel %vm455_vm0, %v1595_v52, %v1597_v27  ;;  %v1839_v62 = vrot.slane %v1733_v43, 2  ;;  %v1841_v63 = vrot.slane %v1734_v58, 2  ;;  %v312_v33 = vmul.f32 %v2669_v18, %v3265_v53 }
  0xe3   : > { %v1691_v21 = vadd.f32 %v1596_v60, %v1447_v57  ;;  %v349_v29 = vadd.f32 %v3223_v11, %v311_v59  ;;  %v1692_v4 = vadd.f32 %v1598_v44, %v1448_v39  ;;  %v398_v8 = vmul.f32 %v2672_v19, %v3260_v3  ;;  %v3549_v59 = vld [vmem:[%s2648_s17 + $0x168] sm:$0xff] }
  0xe4   : > { %v1840_v48 = vsel %vm700_vm1, %v1838_v25, %v1839_v62  ;;  %v399_v1 = vmul.f32 %v2672_v19, %v3265_v53  ;;  %v1842_v56 = vsel %vm700_vm1, %v1839_v62, %v1841_v63  ;;  %v350_v61 = vadd.f32 %v3223_v11, %v312_v33 }
  0xe5   : > { %v1935_v9 = vadd.f32 %v1840_v48, %v1691_v21  ;;  %v400_v10 = vmul.f32 %v2672_v19, %v3275_v30  ;;  %v1936_v7 = vadd.f32 %v1842_v56, %v1692_v4  ;;  %v521_v13 = vrot.slane %v398_v8, 1  ;;  %v3554_v21 = vld [vmem:[%s2648_s17 + $0x170] sm:$0xff] }
  0xe6   : > { %v522_v17 = vrot.slane %v399_v1, 1  ;;  %v643_v26 = vmul.f32 %v2675_v20, %v3260_v3  ;;  %v644_v0 = vmul.f32 %v2675_v20, %v3265_v53  ;;  %v645_v6 = vmul.f32 %v2675_v20, %v3275_v30 }
  0xe7   : > { %v524_v55 = vrot.slane %v400_v10, 1  ;;  %v875_v35 = vmul.f32 %v2683_v22, %v3405_v15  ;;  %v1962_v2 = vpack.c.bf16 %v1936_v7, %v1935_v9  ;;  %v876_v41 = vmul.f32 %v2683_v22, %v3415_v46  ;;  %v3564_v9 = vld [vmem:[%s2648_s17 + $0x178] sm:$0x3] }
  0xe8   : > { %v523_v36 = vsel %vm455_vm0, %v521_v13, %v522_v17  ;;  %v766_v38 = vrot.slane %v643_v26, 2  ;;  %v767_v45 = vrot.slane %v644_v0, 2  ;;  %v769_v14 = vrot.slane %v645_v6, 2 }
  0xe9   : > { %v525_v42 = vsel %vm455_vm0, %v522_v17, %v524_v55  ;;  %v594_v3 = vadd.f32 %v523_v36, %v349_v29  ;;  %2385 = vmatmul.mubr.bf16.gmra.mrb[8].mxu0 %v1962_v2  ;;  %v956_v30 = vmul.f32 %v2686_v23, %v3405_v15  ;;  %v957_v49 = vmul.f32 %v2686_v23, %v3415_v46 }
  0xea   : > { %v595_v53 = vadd.f32 %v525_v42, %v350_v61  ;;  %v958_v12 = vmul.f32 %v2686_v23, %v3419_v34  ;;  %v768_v50 = vsel %vm700_vm1, %v766_v38, %v767_v45  ;;  %v770_v51 = vsel %vm700_vm1, %v767_v45, %v769_v14 }
  0xeb   : > { %v1200_v52 = vmul.f32 %v2689_v24, %v3405_v15  ;;  %v1201_v27 = vmul.f32 %v2689_v24, %v3415_v46  ;;  %v839_v43 = vadd.f32 %v768_v50, %v594_v3  ;;  %v1078_v58 = vrot.slane %v956_v30, 1 }
  0xec   : > { %v840_v57 = vadd.f32 %v770_v51, %v595_v53  ;;  %v1079_v25 = vrot.slane %v957_v49, 1  ;;  %v1081_v39 = vrot.slane %v958_v12, 1  ;;  %v1202_v60 = vmul.f32 %v2689_v24, %v3419_v34 }
  0xed   : > { %v1322_v44 = vrot.slane %v1200_v52, 2  ;;  %v1323_v62 = vrot.slane %v1201_v27, 2  ;;  %v907_v63 = vadd.f32 %v875_v35, %v839_v43  ;;  %v1431_v4 = vmul.f32 %v2699_v32, %v3549_v59 }
  0xee   : > { %v908_v33 = vadd.f32 %v876_v41, %v840_v57  ;;  %v1080_v29 = vsel %vm455_vm0, %v1078_v58, %v1079_v25  ;;  %v1082_v48 = vsel %vm455_vm0, %v1079_v25, %v1081_v39  ;;  %v1325_v1 = vrot.slane %v1202_v60, 2 }
  0xef   : > { %v1324_v8 = vsel %vm700_vm1, %v1322_v44, %v1323_v62  ;;  %v1432_v56 = vmul.f32 %v2699_v32, %v3554_v21  ;;  %v1151_v61 = vadd.f32 %v1080_v29, %v907_v63  ;;  %v1512_v7 = vmul.f32 %v2763_v28, %v3549_v59 }
  0xf0   : > { %v1152_v10 = vadd.f32 %v1082_v48, %v908_v33  ;;  %v1513_v13 = vmul.f32 %v2763_v28, %v3554_v21  ;;  %v1326_v17 = vsel %vm700_vm1, %v1323_v62, %v1325_v1  ;;  %v1514_v26 = vmul.f32 %v2763_v28, %v3564_v9 }
  0xf1   : > { %v1756_v55 = vmul.f32 %v3287_v37, %v3549_v59  ;;  %v1757_v0 = vmul.f32 %v3287_v37, %v3554_v21  ;;  %v1395_v6 = vadd.f32 %v1324_v8, %v1151_v61  ;;  %v1634_v2 = vrot.slane %v1512_v7, 1 }
  0xf2   : > { %v1396_v35 = vadd.f32 %v1326_v17, %v1152_v10  ;;  %v1635_v36 = vrot.slane %v1513_v13, 1  ;;  %v1637_v38 = vrot.slane %v1514_v26, 1  ;;  %v1758_v41 = vmul.f32 %v3287_v37, %v3564_v9 }
  0xf3   : > { %v1878_v42 = vrot.slane %v1756_v55, 2  ;;  %v1879_v3 = vrot.slane %v1757_v0, 2  ;;  %v1463_v45 = vadd.f32 %v1431_v4, %v1395_v6  ;;  %v297_v30 = vmul.f32 %v2669_v18, %v3334_v16 }
  0xf4   : > { %v1464_v14 = vadd.f32 %v1432_v56, %v1396_v35  ;;  %v1636_v53 = vsel %vm455_vm0, %v1634_v2, %v1635_v36  ;;  %v1638_v49 = vsel %vm455_vm0, %v1635_v36, %v1637_v38  ;;  %v1881_v50 = vrot.slane %v1758_v41, 2 }
  0xf5   : > { %v1880_v12 = vsel %vm700_vm1, %v1878_v42, %v1879_v3  ;;  %v298_v51 = vmul.f32 %v2669_v18, %v3341_v54  ;;  %v1707_v52 = vadd.f32 %v1636_v53, %v1463_v45  ;;  %v335_v43 = vadd.f32 %v3223_v11, %v297_v30 }
  0xf6   : > { %v1708_v27 = vadd.f32 %v1638_v49, %v1464_v14  ;;  %v377_v57 = vmul.f32 %v2672_v19, %v3334_v16  ;;  %v1882_v58 = vsel %vm700_vm1, %v1879_v3, %v1881_v50  ;;  %v378_v39 = vmul.f32 %v2672_v19, %v3341_v54  ;;  %v3623_v50 = vld [vmem:[%s2648_s17 + $0xc0] sm:$0xff] }
  0xf7   : > { %v336_v25 = vadd.f32 %v3223_v11, %v298_v51  ;;  %v379_v60 = vmul.f32 %v2672_v19, %v3350_v40  ;;  %v1951_v44 = vadd.f32 %v1880_v12, %v1707_v52  ;;  %v622_v33 = vmul.f32 %v2675_v20, %v3334_v16 }
  0xf8   : > { %v1952_v62 = vadd.f32 %v1882_v58, %v1708_v27  ;;  %v486_v63 = vrot.slane %v377_v57, 1  ;;  %v487_v29 = vrot.slane %v378_v39, 1  ;;  %v623_v48 = vmul.f32 %v2675_v20, %v3341_v54  ;;  %v3629_v57 = vld [vmem:[%s2648_s17 + $0xc8] sm:$0xff] }
  0xf9   : > { %v489_v4 = vrot.slane %v379_v60, 1  ;;  %v624_v8 = vmul.f32 %v2675_v20, %v3350_v40  ;;  %v731_v56 = vrot.slane %v622_v33, 2  ;;  %v861_v61 = vmul.f32 %v2683_v22, %v3476_v5  ;;  %v3640_v33 = vld [vmem:[%s2648_s17 + $0xd0] sm:$0x3] }
  0xfa   : > { %v1970_v1 = vpack.c.bf16 %v1952_v62, %v1951_v44  ;;  %v862_v10 = vmul.f32 %v2683_v22, %v3485_v47  ;;  %v488_v7 = vsel %vm455_vm0, %v486_v63, %v487_v29  ;;  %v732_v13 = vrot.slane %v623_v48, 2 }
  0xfb   : > { %v490_v16 = vsel %vm455_vm0, %v487_v29, %v489_v4  ;;  %v734_v17 = vrot.slane %v624_v8, 2  ;;  %v580_v26 = vadd.f32 %v488_v7, %v335_v43  ;;  %v935_v40 = vmul.f32 %v2686_v23, %v3476_v5 }
  0xfc   : > { %2401 = vmatmul.mubr.bf16.gmra.mrb[8].mxu1 %v1970_v1  ;;  %v581_v54 = vadd.f32 %v490_v16, %v336_v25  ;;  %v936_v55 = vmul.f32 %v2686_v23, %v3485_v47  ;;  %v733_v0 = vsel %vm700_vm1, %v731_v56, %v732_v13  ;;  %v937_v35 = vmul.f32 %v2686_v23, %v3490_v31 }
  0xfd   : > { %v735_v6 = vsel %vm700_vm1, %v732_v13, %v734_v17  ;;  %v1179_v2 = vmul.f32 %v2689_v24, %v3476_v5  ;;  %v825_v36 = vadd.f32 %v733_v0, %v580_v26  ;;  %v1043_v41 = vrot.slane %v935_v40, 1 }
  0xfe   : > { %v826_v38 = vadd.f32 %v735_v6, %v581_v54  ;;  %v1044_v42 = vrot.slane %v936_v55, 1  ;;  %v1046_v3 = vrot.slane %v937_v35, 1  ;;  %v1180_v45 = vmul.f32 %v2689_v24, %v3485_v47 }
  0xff   : > { %v1181_v14 = vmul.f32 %v2689_v24, %v3490_v31  ;;  %v1287_v53 = vrot.slane %v1179_v2, 2  ;;  %v893_v30 = vadd.f32 %v861_v61, %v825_v36  ;;  %v1417_v51 = vmul.f32 %v3623_v50, %v2699_v32 }
 0x100   : > { %v894_v49 = vadd.f32 %v862_v10, %v826_v38  ;;  %v1045_v12 = vsel %vm455_vm0, %v1043_v41, %v1044_v42  ;;  %v1047_v52 = vsel %vm455_vm0, %v1044_v42, %v1046_v3  ;;  %v1288_v27 = vrot.slane %v1180_v45, 2 }
 0x101   : > { %v1290_v43 = vrot.slane %v1181_v14, 2  ;;  %v1418_v58 = vmul.f32 %v3629_v57, %v2699_v32  ;;  %v1137_v25 = vadd.f32 %v1045_v12, %v893_v30  ;;  %v1491_v60 = vmul.f32 %v3623_v50, %v2763_v28 }
 0x102   : > { %v1138_v39 = vadd.f32 %v1047_v52, %v894_v49  ;;  %v1492_v44 = vmul.f32 %v3629_v57, %v2763_v28  ;;  %v1289_v62 = vsel %vm700_vm1, %v1287_v53, %v1288_v27  ;;  %v1493_v29 = vmul.f32 %v3640_v33, %v2763_v28 }
 0x103   : > { %v1291_v63 = vsel %vm700_vm1, %v1288_v27, %v1290_v43  ;;  %v1735_v4 = vmul.f32 %v3623_v50, %v3287_v37  ;;  %v1381_v48 = vadd.f32 %v1289_v62, %v1137_v25  ;;  %v1599_v1 = vrot.slane %v1491_v60, 1 }
 0x104   : > { %v1382_v8 = vadd.f32 %v1291_v63, %v1138_v39  ;;  %v1600_v56 = vrot.slane %v1492_v44, 1  ;;  %v1602_v61 = vrot.slane %v1493_v29, 1  ;;  %v1736_v10 = vmul.f32 %v3629_v57, %v3287_v37 }
 0x105   : > { %v1737_v7 = vmul.f32 %v3640_v33, %v3287_v37  ;;  %v1843_v16 = vrot.slane %v1735_v4, 2  ;;  %v1449_v13 = vadd.f32 %v1417_v51, %v1381_v48  ;;  %v313_v54 = vmul.f32 %v2669_v18, %v3405_v15 }
 0x106   : > { %v1450_v17 = vadd.f32 %v1418_v58, %v1382_v8  ;;  %v1601_v26 = vsel %vm455_vm0, %v1599_v1, %v1600_v56  ;;  %v1603_v40 = vsel %vm455_vm0, %v1600_v56, %v1602_v61  ;;  %v1844_v55 = vrot.slane %v1736_v10, 2 }
 0x107   : > { %v1846_v0 = vrot.slane %v1737_v7, 2  ;;  %v314_v6 = vmul.f32 %v2669_v18, %v3415_v46  ;;  %v1693_v35 = vadd.f32 %v1601_v26, %v1449_v13  ;;  %v351_v36 = vadd.f32 %v3223_v11, %v313_v54  ;;  %v3689_v7 = vld [vmem:[%s2648_s17 + $0x180] sm:$0xff] }
 0x108   : > { %v1694_v2 = vadd.f32 %v1603_v40, %v1450_v17  ;;  %v401_v38 = vmul.f32 %v2672_v19, %v3405_v15  ;;  %v1845_v41 = vsel %vm700_vm1, %v1843_v16, %v1844_v55  ;;  %v402_v45 = vmul.f32 %v2672_v19, %v3415_v46 }
 0x109   : > { %v1847_v42 = vsel %vm700_vm1, %v1844_v55, %v1846_v0  ;;  %v352_v3 = vadd.f32 %v3223_v11, %v314_v6  ;;  %v1937_v14 = vadd.f32 %v1845_v41, %v1693_v35  ;;  %v403_v30 = vmul.f32 %v2672_v19, %v3419_v34  ;;  %v3699_v6 = vld [vmem:[%s2648_s17 + $0x188] sm:$0xff]  ;;  %v3703_v41 = vld [vmem:[%s2648_s17 + $0x190] sm:$0x3] }
 0x10a   : > { %v1938_v53 = vadd.f32 %v1847_v42, %v1694_v2  ;;  %v526_v49 = vrot.slane %v401_v38, 1  ;;  %v527_v12 = vrot.slane %v402_v45, 1  ;;  %v646_v51 = vmul.f32 %v2675_v20, %v3405_v15 }
 0x10b   : > { %v647_v52 = vmul.f32 %v2675_v20, %v3415_v46  ;;  %v648_v27 = vmul.f32 %v2675_v20, %v3419_v34  ;;  %v529_v43 = vrot.slane %v403_v30, 1  ;;  %v877_v58 = vmul.f32 %v2683_v22, %v3549_v59 }
 0x10c   : > { %v1963_v11 = vpack.c.bf16 %v1938_v53, %v1937_v14  ;;  %v878_v25 = vmul.f32 %v2683_v22, %v3554_v21  ;;  %v528_v39 = vsel %vm455_vm0, %v526_v49, %v527_v12  ;;  %v771_v60 = vrot.slane %v646_v51, 2 }
 0x10d   : > { %v772_v44 = vrot.slane %v647_v52, 2  ;;  %v774_v15 = vrot.slane %v648_v27, 2  ;;  %v530_v46 = vsel %vm455_vm0, %v527_v12, %v529_v43  ;;  %v596_v62 = vadd.f32 %v528_v39, %v351_v36 }
 0x10e   : > { %2388 = vmatprep.mubr.bf16.mxu0 %v1963_v11  ;;  %v959_v34 = vmul.f32 %v2686_v23, %v3549_v59  ;;  %v960_v63 = vmul.f32 %v2686_v23, %v3554_v21  ;;  %v597_v29 = vadd.f32 %v530_v46, %v352_v3  ;;  %v961_v8 = vmul.f32 %v2686_v23, %v3564_v9 }
 0x10f   : > { %v773_v4 = vsel %vm700_vm1, %v771_v60, %v772_v44  ;;  %v775_v48 = vsel %vm700_vm1, %v772_v44, %v774_v15  ;;  %v1203_v10 = vmul.f32 %v2689_v24, %v3549_v59  ;;  %v1204_v17 = vmul.f32 %v2689_v24, %v3554_v21 }
 0x110   : > { %v841_v1 = vadd.f32 %v773_v4, %v596_v62  ;;  %v1083_v56 = vrot.slane %v959_v34, 1  ;;  %v1084_v61 = vrot.slane %v960_v63, 1  ;;  %v842_v16 = vadd.f32 %v775_v48, %v597_v29 }
 0x111   : > { %v1086_v13 = vrot.slane %v961_v8, 1  ;;  %v1205_v26 = vmul.f32 %v2689_v24, %v3564_v9  ;;  %v1327_v55 = vrot.slane %v1203_v10, 2  ;;  %v1433_v0 = vmul.f32 %v2699_v32, %v3689_v7 }
 0x112   : > { %v909_v54 = vadd.f32 %v877_v58, %v841_v1  ;;  %v1085_v40 = vsel %vm455_vm0, %v1083_v56, %v1084_v61  ;;  %v910_v35 = vadd.f32 %v878_v25, %v842_v16  ;;  %v1328_v36 = vrot.slane %v1204_v17, 2 }
 0x113   : > { %v1087_v2 = vsel %vm455_vm0, %v1084_v61, %v1086_v13  ;;  %v1330_v38 = vrot.slane %v1205_v26, 2  ;;  %v1434_v3 = vmul.f32 %v2699_v32, %v3699_v6  ;;  %v1515_v45 = vmul.f32 %v2763_v28, %v3689_v7 }
 0x114   : > { %v1153_v42 = vadd.f32 %v1085_v40, %v909_v54  ;;  %v1516_v14 = vmul.f32 %v2763_v28, %v3699_v6  ;;  %v1154_v53 = vadd.f32 %v1087_v2, %v910_v35  ;;  %v1329_v30 = vsel %vm700_vm1, %v1327_v55, %v1328_v36 }
 0x115   : > { %v1331_v49 = vsel %vm700_vm1, %v1328_v36, %v1330_v38  ;;  %v1517_v12 = vmul.f32 %v2763_v28, %v3703_v41  ;;  %v1639_v52 = vrot.slane %v1515_v45, 1  ;;  %v1759_v11 = vmul.f32 %v3287_v37, %v3689_v7 }
 0x116   : > { %v1397_v51 = vadd.f32 %v1329_v30, %v1153_v42  ;;  %v1640_v27 = vrot.slane %v1516_v14, 1  ;;  %v1398_v43 = vadd.f32 %v1331_v49, %v1154_v53  ;;  %v1760_v25 = vmul.f32 %v3287_v37, %v3699_v6 }
 0x117   : > { %v1642_v58 = vrot.slane %v1517_v12, 1  ;;  %v1761_v39 = vmul.f32 %v3287_v37, %v3703_v41  ;;  %v1883_v15 = vrot.slane %v1759_v11, 2  ;;  %v299_v46 = vmul.f32 %v2669_v18, %v3476_v5  ;;  %v3730_v37 = vld [vmem:[%s3989_s2] ss:$0 sm:$0xff] }
 0x118   : > { %v1465_v60 = vadd.f32 %v1433_v0, %v1397_v51  ;;  %v1641_v44 = vsel %vm455_vm0, %v1639_v52, %v1640_v27  ;;  %v1466_v62 = vadd.f32 %v1434_v3, %v1398_v43  ;;  %v1884_v63 = vrot.slane %v1760_v25, 2 }
 0x119   : > { %v1643_v34 = vsel %vm455_vm0, %v1640_v27, %v1642_v58  ;;  %v1886_v29 = vrot.slane %v1761_v39, 2  ;;  %v300_v48 = vmul.f32 %v2669_v18, %v3485_v47  ;;  %v337_v8 = vadd.f32 %v3730_v37, %v299_v46 }
 0x11a   : > { %v1709_v4 = vadd.f32 %v1641_v44, %v1465_v60  ;;  %v380_v1 = vmul.f32 %v2672_v19, %v3476_v5  ;;  %v1710_v56 = vadd.f32 %v1643_v34, %v1466_v62  ;;  %v1885_v61 = vsel %vm700_vm1, %v1883_v15, %v1884_v63  ;;  %v2480_v34 = vld [vmem:[%s2648_s17 + $0xd8] sm:$0xff] }
 0x11b   : > { %v1887_v10 = vsel %vm700_vm1, %v1884_v63, %v1886_v29  ;;  %v381_v16 = vmul.f32 %v2672_v19, %v3485_v47  ;;  %v338_v17 = vadd.f32 %v3730_v37, %v300_v48  ;;  %v382_v26 = vmul.f32 %v2672_v19, %v3490_v31 }
 0x11c   : > { %v1953_v13 = vadd.f32 %v1885_v61, %v1709_v4  ;;  %v491_v54 = vrot.slane %v380_v1, 1  ;;  %v1954_v40 = vadd.f32 %v1887_v10, %v1710_v56  ;;  %v625_v0 = vmul.f32 %v2675_v20, %v3476_v5  ;;  %v2481_v56 = vld [vmem:[%s2648_s17 + $0xe0] sm:$0xff] }
 0x11d   : > { %v492_v55 = vrot.slane %v381_v16, 1  ;;  %v626_v35 = vmul.f32 %v2675_v20, %v3485_v47  ;;  %v494_v2 = vrot.slane %v382_v26, 1  ;;  %v627_v36 = vmul.f32 %v2675_v20, %v3490_v31 }
 0x11e   : > { %v863_v38 = vmul.f32 %v3623_v50, %v2683_v22  ;;  %v864_v42 = vmul.f32 %v3629_v57, %v2683_v22  ;;  %v1971_v3 = vpack.c.bf16 %v1954_v40, %v1953_v13  ;;  %v736_v14 = vrot.slane %v625_v0, 2  ;;  %v2482_v13 = vld [vmem:[%s2648_s17 + $0xe8] sm:$0x3] }
 0x11f   : > { %v493_v45 = vsel %vm455_vm0, %v491_v54, %v492_v55  ;;  %v737_v53 = vrot.slane %v626_v35, 2  ;;  %v495_v5 = vsel %vm455_vm0, %v492_v55, %v494_v2  ;;  %v739_v49 = vrot.slane %v627_v36, 2  ;;  %v3783_v55 = vld [vmem:[%s3988_s1 + $0x8] ss:$0 sm:$0xff] }
 0x120   : > { %v582_v30 = vadd.f32 %v493_v45, %v337_v8  ;;  %v938_v47 = vmul.f32 %v3623_v50, %v2686_v23  ;;  %2404 = vmatprep.mubr.bf16.mxu1 %v1971_v3  ;;  %v583_v31 = vadd.f32 %v495_v5, %v338_v17  ;;  %v939_v51 = vmul.f32 %v3629_v57, %v2686_v23 }
 0x121   : > { %v738_v12 = vsel %vm700_vm1, %v736_v14, %v737_v53  ;;  %v940_v52 = vmul.f32 %v3640_v33, %v2686_v23  ;;  %v740_v27 = vsel %vm700_vm1, %v737_v53, %v739_v49  ;;  %v1182_v58 = vmul.f32 %v3623_v50, %v2689_v24 }
 0x122   : > { %v827_v11 = vadd.f32 %v738_v12, %v582_v30  ;;  %v1048_v43 = vrot.slane %v938_v47, 1  ;;  %v828_v25 = vadd.f32 %v740_v27, %v583_v31  ;;  %v1049_v39 = vrot.slane %v939_v51, 1 }
 0x123   : > { %v1051_v60 = vrot.slane %v940_v52, 1  ;;  %v1183_v44 = vmul.f32 %v3629_v57, %v2689_v24  ;;  %v1184_v46 = vmul.f32 %v3640_v33, %v2689_v24  ;;  %v1292_v62 = vrot.slane %v1182_v58, 2 }
 0x124   : > { %v895_v15 = vadd.f32 %v863_v38, %v827_v11  ;;  %v1419_v63 = vmul.f32 %v2480_v34, %v2699_v32  ;;  %v896_v29 = vadd.f32 %v864_v42, %v828_v25  ;;  %v1050_v4 = vsel %vm455_vm0, %v1048_v43, %v1049_v39 }
 0x125   : > { %v1052_v50 = vsel %vm455_vm0, %v1049_v39, %v1051_v60  ;;  %v1293_v48 = vrot.slane %v1183_v44, 2  ;;  %v1295_v1 = vrot.slane %v1184_v46, 2  ;;  %v1420_v57 = vmul.f32 %v2481_v56, %v2699_v32 }
 0x126   : > { %v1139_v8 = vadd.f32 %v1050_v4, %v895_v15  ;;  %v1494_v61 = vmul.f32 %v2480_v34, %v2763_v28  ;;  %v1140_v10 = vadd.f32 %v1052_v50, %v896_v29  ;;  %v1495_v16 = vmul.f32 %v2481_v56, %v2763_v28 }
 0x127   : > { %v1294_v33 = vsel %vm700_vm1, %v1292_v62, %v1293_v48  ;;  %v1496_v17 = vmul.f32 %v2482_v13, %v2763_v28  ;;  %v1296_v26 = vsel %vm700_vm1, %v1293_v48, %v1295_v1  ;;  %v1738_v0 = vmul.f32 %v3783_v55, %v2480_v34 }
 0x128   : > { %v1383_v54 = vadd.f32 %v1294_v33, %v1139_v8  ;;  %v1604_v40 = vrot.slane %v1494_v61, 1  ;;  %v1384_v35 = vadd.f32 %v1296_v26, %v1140_v10  ;;  %v1605_v2 = vrot.slane %v1495_v16, 1  ;;  %v275_v16 = vld [vmem:[%s2648_s17 + $0x198] sm:$0xff] }
 0x129   : > { %v1607_v36 = vrot.slane %v1496_v17, 1  ;;  %v1739_v38 = vmul.f32 %v3783_v55, %v2481_v56  ;;  %v1740_v3 = vmul.f32 %v3783_v55, %v2482_v13  ;;  %v1848_v45 = vrot.slane %v1738_v0, 2 }
 0x12a   : > { %v1451_v42 = vadd.f32 %v1419_v63, %v1383_v54  ;;  %v315_v14 = vmul.f32 %v2669_v18, %v3549_v59  ;;  %v1452_v53 = vadd.f32 %v1420_v57, %v1384_v35  ;;  %v1606_v5 = vsel %vm455_vm0, %v1604_v40, %v1605_v2  ;;  %v276_v54 = vld [vmem:[%s2648_s17 + $0x1a0] sm:$0xff] }
 0x12b   : > { %v1608_v30 = vsel %vm455_vm0, %v1605_v2, %v1607_v36  ;;  %v1849_v49 = vrot.slane %v1739_v38, 2  ;;  %v3792_v47 = vpop.f32.mrb[0].mxu0  ;;  %v1851_v12 = vrot.slane %v1740_v3, 2  ;;  %v316_v51 = vmul.f32 %v2669_v18, %v3554_v21  ;;  %v277_v3 = vld [vmem:[%s2648_s17 + $0x1a8] sm:$0x3]  ;;  %s2317_s17 = sshll.u32 %s215_s9, 8 }
 0x12c   : > { %v1695_v31 = vadd.f32 %v1606_v5, %v1451_v42  ;;  %v353_v52 = vadd.f32 %v3730_v37, %v315_v14  ;;  %v3797_v27 = vpop.f32.mrb[1].mxu0  ;;  %v1696_v11 = vadd.f32 %v1608_v30, %v1452_v53  ;;  %v404_v58 = vmul.f32 %v2672_v19, %v3549_v59  ;;  %s3867_s12 = scalar_lea.vmem [#allocation2], %s2317_s17 }
 0x12d   : > { %v1850_v43 = vsel %vm700_vm1, %v1848_v45, %v1849_v49  ;;  %v405_v25 = vmul.f32 %v2672_v19, %v3554_v21  ;;  %v3804_v39 = vpop.f32.mrb[2].mxu0  ;;  %v1852_v60 = vsel %vm700_vm1, %v1849_v49, %v1851_v12  ;;  %v354_v18 = vadd.f32 %v3730_v37, %v316_v51  ;;  %s2251_s14 = sshll.u32 %s3867_s12, 4  ;;  %s3938_s14 = int_to_ptr.vmem [resolvable:$true] %s2251_s14 }
 0x12e   : > { %v1939_v44 = vadd.f32 %v1850_v43, %v1695_v31  ;;  %v406_v15 = vmul.f32 %v2672_v19, %v3564_v9  ;;  %v3810_v46 = vpop.f32.mrb[3].mxu0  ;;  %v1940_v62 = vadd.f32 %v1852_v60, %v1696_v11  ;;  %v531_v34 = vrot.slane %v404_v58, 1  ;;  %s2484_s25 = scalar_lea.vmem %s3938_s14, 4096  ;;  %p2491_p0 = scmp.lt.s32.totalorder %s3938_s14, %s2489_s30 }
 0x12f   : > { %v532_v63 = vrot.slane %v405_v25, 1  ;;  %v649_v29 = vmul.f32 %v2675_v20, %v3549_v59  ;;  %v650_v50 = vmul.f32 %v2675_v20, %v3554_v21  ;;  %v651_v48 = vmul.f32 %v2675_v20, %v3564_v9  ;;  %p2485_p11 = scmp.ne.s32.totalorder %s3938_s14, %s2484_s25  ;;  %p2492_p1 = scmp.lt.s32.totalorder %s2490_s6, %s2484_s25 }
 0x130   : > { %v534_v4 = vrot.slane %v406_v15, 1  ;;  %v879_v37 = vmul.f32 %v2683_v22, %v3689_v7  ;;  %v1964_v19 = vpack.c.bf16 %v1940_v62, %v1939_v44  ;;  %v880_v56 = vmul.f32 %v2683_v22, %v3699_v6 }
 0x131   : > { %v533_v8 = vsel %vm455_vm0, %v531_v34, %v532_v63  ;;  %v776_v1 = vrot.slane %v649_v29, 2  ;;  %v777_v61 = vrot.slane %v650_v50, 2  ;;  %v779_v21 = vrot.slane %v651_v48, 2  ;;  %p2486_p12 = pnand %p2485_p11, %p2619_p5  ;;  %p2493_p2 = por %p2492_p1, %p2491_p0 }
 0x132   : > { %v535_v59 = vsel %vm455_vm0, %v532_v63, %v534_v4  ;;  %v598_v57 = vadd.f32 %v533_v8, %v353_v52  ;;  %2389 = vmatmul.mubr.bf16.gmra.mrb[12].mxu0 %v1964_v19  ;;  %v962_v20 = vmul.f32 %v2686_v23, %v3689_v7  ;;  %v963_v9 = vmul.f32 %v2686_v23, %v3699_v6 }
 0x133   : > { %v599_v10 = vadd.f32 %v535_v59, %v354_v18  ;;  %v964_v33 = vmul.f32 %v2686_v23, %v3703_v41  ;;  %v778_v22 = vsel %vm700_vm1, %v776_v1, %v777_v61  ;;  %v780_v13 = vsel %vm700_vm1, %v777_v61, %v779_v21  ;;  %p2487_p13 = pneg %p2486_p12 }
 0x134   : > { %v1206_v17 = vmul.f32 %v2689_v24, %v3689_v7  ;;  %v1207_v26 = vmul.f32 %v2689_v24, %v3699_v6  ;;  %v843_v40 = vadd.f32 %v778_v22, %v598_v57  ;;  %v1088_v35 = vrot.slane %v962_v20, 1 }
 0x135   : > { %v844_v0 = vadd.f32 %v780_v13, %v599_v10  ;;  %v1089_v2 = vrot.slane %v963_v9, 1  ;;  %v1091_v36 = vrot.slane %v964_v33, 1  ;;  %v1208_v23 = vmul.f32 %v2689_v24, %v3703_v41  ;;  %p2494_p3 = pnand %p2493_p2, %p2487_p13 }
 0x136   : > { %v1332_v38 = vrot.slane %v1206_v17, 2  ;;  %v1333_v42 = vrot.slane %v1207_v26, 2  ;;  %v911_v45 = vadd.f32 %v879_v37, %v843_v40  ;;  %v1435_v6 = vmul.f32 %v2699_v32, %v275_v16 }
 0x137   : > { %v912_v14 = vadd.f32 %v880_v56, %v844_v0  ;;  %v1090_v7 = vsel %vm455_vm0, %v1088_v35, %v1089_v2  ;;  %v1092_v53 = vsel %vm455_vm0, %v1089_v2, %v1091_v36  ;;  %v1335_v30 = vrot.slane %v1208_v23, 2 }
 0x138   : > { %v1334_v5 = vsel %vm700_vm1, %v1332_v38, %v1333_v42  ;;  %v1436_v49 = vmul.f32 %v2699_v32, %v276_v54  ;;  %v1155_v31 = vadd.f32 %v1090_v7, %v911_v45  ;;  %v1518_v41 = vmul.f32 %v2763_v28, %v275_v16  ;;  %v3858_v32 = vld [vmem:[%s3991_s4] ss:$0 sm:$0xff] }
 0x139   : > { %v1156_v24 = vadd.f32 %v1092_v53, %v912_v14  ;;  %v1519_v12 = vmul.f32 %v2763_v28, %v276_v54  ;;  %v1336_v51 = vsel %vm700_vm1, %v1333_v42, %v1335_v30  ;;  %v1520_v52 = vmul.f32 %v2763_v28, %v277_v3 }
 0x13a   : > { %v1762_v11 = vmul.f32 %v3783_v55, %v275_v16  ;;  %v1763_v43 = vmul.f32 %v3783_v55, %v276_v54  ;;  %v1399_v58 = vadd.f32 %v1334_v5, %v1155_v31  ;;  %v1644_v60 = vrot.slane %v1518_v41, 1 }
 0x13b   : > { %v1400_v25 = vadd.f32 %v1336_v51, %v1156_v24  ;;  %v1645_v44 = vrot.slane %v1519_v12, 1  ;;  %v1647_v18 = vrot.slane %v1520_v52, 1  ;;  %v1764_v15 = vmul.f32 %v3783_v55, %v277_v3 }
 0x13c   : > { %v1888_v62 = vrot.slane %v1762_v11, 2  ;;  %v1889_v34 = vrot.slane %v1763_v43, 2  ;;  %v1467_v63 = vadd.f32 %v1435_v6, %v1399_v58  ;;  %v2087_v4 = vadd.f32 %v3792_v47, %v3858_v32 }
 0x13d   : > { %v1468_v28 = vadd.f32 %v1436_v49, %v1400_v25  ;;  %v1646_v29 = vsel %vm455_vm0, %v1644_v60, %v1645_v44  ;;  %v2394_v50 = vpop.f32.mrb[0].mxu1  ;;  %v1648_v48 = vsel %vm455_vm0, %v1645_v44, %v1647_v18  ;;  %v1891_v19 = vrot.slane %v1764_v15, 2 }
 0x13e   : > { %v1890_v37 = vsel %vm700_vm1, %v1888_v62, %v1889_v34  ;;  %v2151_v8 = vadd.f32 %v2394_v50, %v3858_v32  ;;  %v2142_v1 = vpop.f32.mrb[1].mxu1  ;;  %v1711_v56 = vadd.f32 %v1646_v29, %v1467_v63  ;;  %2207 = vst [vmem:[%s3867_s12 + $0x10] sm:$0xff] %v2087_v4  ;;  %v2079_v47 = vadd.f32 %v3858_v32, %v3797_v27 }
 0x13f   : > { %v1712_v55 = vadd.f32 %v1648_v48, %v1468_v28  ;;  %v2143_v59 = vadd.f32 %v3858_v32, %v2142_v1  ;;  %v2395_v57 = vpop.f32.mrb[2].mxu1  ;;  %v1892_v61 = vsel %vm700_vm1, %v1889_v34, %v1891_v19  ;;  %v2090_v21 = vadd.f32 %v3804_v39, %v3858_v32 }
 0x140   : > { %2223 = vst [vmem:[%s3867_s12 + $0x90] sm:$0xff] %v2151_v8  ;;  %v2154_v10 = vadd.f32 %v2395_v57, %v3858_v32  ;;  %v2082_v20 = vadd.f32 %v3858_v32, %v3810_v46  ;;  %v2145_v9 = vpop.f32.mrb[3].mxu1  ;;  %v1955_v33 = vadd.f32 %v1890_v37, %v1711_v56  ;;  %2205 = vst [vmem:[%s3867_s12] sm:$0xff] %v2079_v47 }
 0x141   : > { %v1956_v27 = vadd.f32 %v1892_v61, %v1712_v55  ;;  %2221 = vst [vmem:[%s3867_s12 + $0x80] sm:$0xff] %v2143_v59  ;;  %v2146_v16 = vadd.f32 %v3858_v32, %v2145_v9  ;;  %2208 = vst [vmem:[%s3867_s12 + $0x18] sm:$0xff] %v2090_v21 }
 0x142   : > { %2224 = vst [vmem:[%s3867_s12 + $0x98] sm:$0xff] %v2154_v10  ;;  %2206 = vst [vmem:[%s3867_s12 + $0x8] sm:$0xff] %v2082_v20 }
 0x143   : > { %v1972_v39 = vpack.c.bf16 %v1956_v27, %v1955_v33  ;;  %2222 = vst [vmem:[%s3867_s12 + $0x88] sm:$0xff] %v2146_v16 }
 0x145   : > { %2405 = vmatmul.mubr.bf16.gmra.mrb[12].mxu1 %v1972_v39 }
 0x173   : > { %v2382_v22 = vpop.f32.mrb[4].mxu0 }
 0x174   : > { %v2103_v46 = vadd.f32 %v2382_v22, %v3858_v32  ;;  %v2094_v13 = vpop.f32.mrb[5].mxu0 }
 0x175   : > { %v2095_v17 = vadd.f32 %v3858_v32, %v2094_v13  ;;  %v2383_v26 = vpop.f32.mrb[6].mxu0 }
 0x176   : > { %2211 = vst [vmem:[%s3867_s12 + $0x30] sm:$0xff] %v2103_v46  ;;  %v2106_v54 = vadd.f32 %v2383_v26, %v3858_v32  ;;  %v2097_v40 = vpop.f32.mrb[7].mxu0 }
 0x177   : > { %2209 = vst [vmem:[%s3867_s12 + $0x20] sm:$0xff] %v2095_v17  ;;  %v2098_v0 = vadd.f32 %v3858_v32, %v2097_v40 }
 0x178   : > { %2212 = vst [vmem:[%s3867_s12 + $0x38] sm:$0xff] %v2106_v54 }
 0x179   : > { %2210 = vst [vmem:[%s3867_s12 + $0x28] sm:$0xff] %v2098_v0 }
 0x186   : > { %v2398_v35 = vpop.f32.mrb[4].mxu1 }
 0x187   : > { %v2167_v2 = vadd.f32 %v2398_v35, %v3858_v32  ;;  %v2158_v36 = vpop.f32.mrb[5].mxu1 }
 0x188   : > { %v2159_v23 = vadd.f32 %v3858_v32, %v2158_v36  ;;  %v2399_v38 = vpop.f32.mrb[6].mxu1 }
 0x189   : > { %2227 = vst [vmem:[%s3867_s12 + $0xb0] sm:$0xff] %v2167_v2  ;;  %v2170_v42 = vadd.f32 %v2399_v38, %v3858_v32  ;;  %v2161_v3 = vpop.f32.mrb[7].mxu1 }
 0x18a   : > { %2225 = vst [vmem:[%s3867_s12 + $0xa0] sm:$0xff] %v2159_v23  ;;  %v2162_v45 = vadd.f32 %v3858_v32, %v2161_v3 }
 0x18b   : > { %2228 = vst [vmem:[%s3867_s12 + $0xb8] sm:$0xff] %v2170_v42 }
 0x18c   : > { %2226 = vst [vmem:[%s3867_s12 + $0xa8] sm:$0xff] %v2162_v45 }
 0x1bc   : > { %v2386_v14 = vpop.f32.mrb[8].mxu0 }
 0x1bd   : > { %v2119_v7 = vadd.f32 %v2386_v14, %v3858_v32  ;;  %v2110_v6 = vpop.f32.mrb[9].mxu0 }
 0x1be   : > { %v2111_v53 = vadd.f32 %v3858_v32, %v2110_v6  ;;  %v2387_v5 = vpop.f32.mrb[10].mxu0 }
 0x1bf   : > { %2215 = vst [vmem:[%s3867_s12 + $0x50] sm:$0xff] %v2119_v7  ;;  %v2122_v30 = vadd.f32 %v2387_v5, %v3858_v32  ;;  %v2113_v49 = vpop.f32.mrb[11].mxu0 }
 0x1c0   : > { %2213 = vst [vmem:[%s3867_s12 + $0x40] sm:$0xff] %v2111_v53  ;;  %v2114_v31 = vadd.f32 %v3858_v32, %v2113_v49 }
 0x1c1   : > { %2216 = vst [vmem:[%s3867_s12 + $0x58] sm:$0xff] %v2122_v30 }
 0x1c2   : > { %2214 = vst [vmem:[%s3867_s12 + $0x48] sm:$0xff] %v2114_v31 }
 0x1cf   : > { %v2402_v24 = vpop.f32.mrb[8].mxu1 }
 0x1d0   : > { %v2183_v41 = vadd.f32 %v2402_v24, %v3858_v32  ;;  %v2174_v12 = vpop.f32.mrb[9].mxu1 }
 0x1d1   : > { %v2175_v51 = vadd.f32 %v3858_v32, %v2174_v12  ;;  %v2403_v52 = vpop.f32.mrb[10].mxu1 }
 0x1d2   : > { %2231 = vst [vmem:[%s3867_s12 + $0xd0] sm:$0xff] %v2183_v41  ;;  %v2186_v11 = vadd.f32 %v2403_v52, %v3858_v32  ;;  %v2177_v43 = vpop.f32.mrb[11].mxu1 }
 0x1d3   : > { %2229 = vst [vmem:[%s3867_s12 + $0xc0] sm:$0xff] %v2175_v51  ;;  %v2178_v58 = vadd.f32 %v3858_v32, %v2177_v43 }
 0x1d4   : > { %2232 = vst [vmem:[%s3867_s12 + $0xd8] sm:$0xff] %v2186_v11 }
 0x1d5   : > { %2230 = vst [vmem:[%s3867_s12 + $0xc8] sm:$0xff] %v2178_v58 }
 0x205   : > { %v2390_v25 = vpop.f32.mrb[12].mxu0 }
 0x206   : > { %v2135_v60 = vadd.f32 %v2390_v25, %v3858_v32  ;;  %v2126_v44 = vpop.f32.mrb[13].mxu0 }
 0x207   : > { %v2127_v18 = vadd.f32 %v3858_v32, %v2126_v44  ;;  %v2391_v15 = vpop.f32.mrb[14].mxu0 }
 0x208   : > { %2219 = vst [vmem:[%s3867_s12 + $0x70] sm:$0xff] %v2135_v60  ;;  %v2138_v62 = vadd.f32 %v2391_v15, %v3858_v32  ;;  %v2129_v34 = vpop.f32.mrb[15].mxu0 }
 0x209   : > { %2217 = vst [vmem:[%s3867_s12 + $0x60] sm:$0xff] %v2127_v18  ;;  %v2130_v63 = vadd.f32 %v3858_v32, %v2129_v34 }
 0x20a   : > { %2220 = vst [vmem:[%s3867_s12 + $0x78] sm:$0xff] %v2138_v62 }
 0x20b   : > { %2218 = vst [vmem:[%s3867_s12 + $0x68] sm:$0xff] %v2130_v63 }
 0x218   : > { %v2406_v28 = vpop.f32.mrb[12].mxu1 }
 0x219   : > { %v2199_v29 = vadd.f32 %v2406_v28, %v3858_v32  ;;  %v2190_v4 = vpop.f32.mrb[13].mxu1 }
 0x21a   : > { %v2191_v50 = vadd.f32 %v3858_v32, %v2190_v4  ;;  %v2407_v48 = vpop.f32.mrb[14].mxu1 }
 0x21b   : > { %2235 = vst [vmem:[%s3867_s12 + $0xf0] sm:$0xff] %v2199_v29  ;;  %v2202_v37 = vadd.f32 %v2407_v48, %v3858_v32  ;;  %v2193_v19 = vpop.f32.mrb[15].mxu1 }
 0x21c   : > { %2233 = vst [vmem:[%s3867_s12 + $0xe0] sm:$0xff] %v2191_v50  ;;  %v2194_v8 = vadd.f32 %v3858_v32, %v2193_v19 }
 0x21d   : > { %2236 = vst [vmem:[%s3867_s12 + $0xf8] sm:$0xff] %v2202_v37 }
 0x21e   : > { %2234 = vst [vmem:[%s3867_s12 + $0xe8] sm:$0xff] %v2194_v8 }
 0x21f   : > { %2497 = shalt.err (!%p2494_p3)
}
 0x220   : > { %s2498_s7 = scalar_lea.hbm %s3936_s23, 4096  ;;  %s2502_s17 = scalar_lea.hbm %s3992_s5, 8192 }
 0x221   : > { %p2499_p4 = scmp.ne.s32.totalorder %s3936_s23, %s2498_s7  ;;  %p2503_p9 = scmp.lt.u32.totalorder %s3936_s23, %s3992_s5 }
 0x222   : > { %p2504_p10 = scmp.lt.u32.totalorder %s2502_s17, %s2498_s7  ;;  %p2506_p12 = scmp.lt.u32.totalorder %s2498_s7, %s3936_s23 }
 0x223   : > { %p2500_p7 = pnand %p2499_p4, %p2619_p5 }
 0x224   : > { %p2505_p11 = por %p2504_p10, %p2503_p9 }
 0x225   : > { %p2501_p8 = pneg %p2500_p7 }
 0x226   : > { %p2507_p13 = por %p2506_p12, %p2505_p11 }
 0x228   : > { %p2508_p0 = pnand %p2507_p13, %p2501_p8 }
 0x22a   : > { %2511 = shalt.err (!%p2508_p0)
}
 0x22b   : > { %s2549_s12 = smov 128   ;;  %s2550_s13 = smov 8  }
 0x22c   : > { %2425 = dma.vmem_to_hbm [thread:$0]  (%p2619_p5), %s3938_s14, 4096, %s3936_s23, %s3946_s22, %s2549_s12, %s2549_s12, %s2550_s13  }
 0x22d PF: > { %p2431_p1 = scmp.ge.s32.totalorder %s2546_s21, 2  ;;  %s2266_s15 = sand.u32 1, %s2534_s18  }
 0x22e   : > { %s2267_s16 = scalar_lea.sflag [#allocation3], %s2266_s15 }
 0x22f   : > { %p2428_p2 = pnand %p2431_p1, %p2623_p6 }
 0x231   : > { %2529 = dma.done.wait (!%p2428_p2), %s2267_s16, 4096  }
 0x232   : > { %2531 = vsyncadd (!%p2428_p2), %s2267_s16, 4294963200  ;;  %p15_p3 = scmp.ge.s32.totalorder %s2606_s24, 4   ;;  %s3995_s18 = smov %s2538_s19 }
 0x233   : > { %s3996_s19 = smov %s2542_s20  ;;  %s3997_s20 = smov %s2617_s27 }
 0x234   : > { %s3998_s21 = smov %s2606_s24  ;;  %17 = sbr.rel (!%p15_p3) target bundleno = 3 (0x3), region = 75 }
 0x23b   :  { %2272 = vsyncpa [#allocation3], 1 }
 0x23c   :  { %2274 = vsyncpa [#allocation3 + $0x1], 1 }

</bundles_post_ra>
